<compile_context>
chip_gen: v6e
topology: v6e:2x2x1
jax: 0.10.0
libtpu: 0.0.40
codegen_flags: <defaults>
</compile_context>

<pallas_src>
import functools

import jax
import jax.numpy as jnp
from jax import lax
from jax.experimental import pallas as pl
from jax.experimental.pallas import tpu as pltpu


def _round_up(x, m):
    return ((x + m - 1) // m) * m


def _mha_kernel(q_ref, k_ref, v_ref, wq_ref, wk_ref, wv_ref, wo_ref, o_ref,
                kf_scr, vf_scr, *, heads, d_k):
    f32, bf16 = jnp.float32, jnp.bfloat16
    H, dk = heads, d_k
    scale = 1.0 / (dk ** 0.5)

    # --- K/V projections: once per batch element.  The q-tile axis is the
    # innermost ('arbitrary') grid axis, so program_id(1) == 0 marks the first
    # q tile of this batch element.  Full-width (Lk, D) @ (D, D) matmuls keep
    # the MXU lane-dense; results are cached in VMEM scratch as bf16.
    @pl.when(pl.program_id(1) == 0)
    def _project_kv():
        kf = jnp.dot(k_ref[0], wk_ref[...], preferred_element_type=f32)
        vf = jnp.dot(v_ref[0], wv_ref[...], preferred_element_type=f32)
        kf_scr[...] = kf.astype(bf16)
        vf_scr[...] = vf.astype(bf16)

    # --- Q projection for this q-row tile: one lane-dense D-wide matmul.
    qf = jnp.dot(q_ref[0], wq_ref[...], preferred_element_type=f32)   # (Tq, D)
    qf = (qf * scale).astype(bf16)                                    # cast once

    kf = kf_scr[...]                                                  # (Lk, D) bf16
    vf = vf_scr[...]                                                  # (Lk, D) bf16

    # --- Per-head scaled dot-product attention.  The score / PV matmuls are
    # inherently per-head (K or N equal to d_k); heads are a static unrolled
    # loop over lane slices, and the head outputs are concatenated along the
    # lane axis so the output projection below is a single K = D matmul.
    attn_heads = []
    for h in range(H):
        lo = h * dk
        qh = qf[:, lo:lo + dk]                                        # (Tq, dk)
        kh = kf[:, lo:lo + dk]                                        # (Lk, dk)
        vh = vf[:, lo:lo + dk]                                        # (Lk, dk)

        # scores: contract over d_k ("nt" matmul), f32 accumulation.
        s = lax.dot_general(qh, kh, (((1,), (1,)), ((), ())),
                            preferred_element_type=f32)               # (Tq, Lk)

        # numerically-stable softmax, elementwise math in f32.
        m = jnp.max(s, axis=-1, keepdims=True)
        e = jnp.exp(s - m)
        p = e * pl.reciprocal(jnp.sum(e, axis=-1, keepdims=True), approx=True)
        # TODO(synk): attention-score dropout omitted (eval-mode identity).

        attn_heads.append(
            jnp.dot(p.astype(bf16), vh, preferred_element_type=f32).astype(bf16))

    cat = jnp.concatenate(attn_heads, axis=-1)                        # (Tq, D) bf16

    # --- Output projection: single (Tq, D) @ (D, D) matmul (K = D, N = D).
    out = jnp.dot(cat, wo_ref[...], preferred_element_type=f32)       # (Tq, D)
    o_ref[0] = out.astype(o_ref.dtype)


def multi_head_attention(q, k, v, wq, wk, wv, wo, *, heads, q_tile=256):
    """q, k, v: (B, L, d_model).  wq/wk/wv/wo: (d_model, d_model) input-major
    (y = x @ W), i.e. the transpose of the corresponding nn.Linear.weight."""
    B, L, D = q.shape
    assert D % heads == 0
    d_k = D // heads
    bf16 = jnp.bfloat16

    # bf16 operands for the MXU; all accumulation stays f32 inside the kernel.
    qb, kb, vb = q.astype(bf16), k.astype(bf16), v.astype(bf16)
    wqb, wkb, wvb, wob = (w.astype(bf16) for w in (wq, wk, wv, wo))

    # Query-row tiling: pad the *query* sequence only, up to a multiple of the
    # tile, so the tile is always a multiple of 8 sublanes and never silently
    # collapses to the whole sequence.  Padded query rows are sliced off after
    # the call; K/V stay at the true length, so softmax is unaffected.
    tl = min(q_tile, _round_up(L, 8))
    Lq = _round_up(L, tl)
    n_qt = Lq // tl
    if Lq != L:
        qb = jnp.pad(qb, ((0, 0), (0, Lq - L), (0, 0)))

    kernel = functools.partial(_mha_kernel, heads=heads, d_k=d_k)

    # Advisory cost estimate (K/V projections counted once per batch element).
    flops = 8 * B * L * D * D + 4 * B * heads * L * L * d_k
    cost = pl.CostEstimate(
        flops=flops,
        transcendentals=B * heads * L * L,
        bytes_accessed=3 * B * L * D * 2 + 4 * D * D * 2 + B * L * D * 4,
    )

    def build(weight_mode):
        q_spec = pl.BlockSpec((1, tl, D), lambda b, i: (b, i, 0))
        kv_spec = pl.BlockSpec((1, L, D), lambda b, i: (b, 0, 0))
        # Constant-index weight blocks: single-buffering them halves their
        # VMEM footprint (matters on v7x's 64 MiB VMEM at large d_model).
        w_spec = pl.BlockSpec((D, D), lambda b, i: (0, 0),
                              pipeline_mode=weight_mode)
        out_spec = pl.BlockSpec((1, tl, D), lambda b, i: (b, i, 0))
        return pl.pallas_call(
            kernel,
            out_shape=jax.ShapeDtypeStruct((B, Lq, D), q.dtype),
            grid_spec=pltpu.PrefetchScalarGridSpec(
                num_scalar_prefetch=0,
                grid=(B, n_qt),
                in_specs=[q_spec, kv_spec, kv_spec,
                          w_spec, w_spec, w_spec, w_spec],
                out_specs=out_spec,
                scratch_shapes=[pltpu.VMEM((L, D), bf16),   # projected K
                                pltpu.VMEM((L, D), bf16)],  # projected V
            ),
            compiler_params=pltpu.CompilerParams(
                # Batch axis stays 'parallel' (extent >= 2 keeps both v7x
                # TensorCores busy); the q-tile axis carries the projected
                # K/V scratch across iterations, so it must be 'arbitrary'.
                dimension_semantics=("parallel", "arbitrary"),
                vmem_limit_bytes=64 * 1024 * 1024,
            ),
            cost_estimate=cost,
        )

    args = (qb, kb, vb, wqb, wkb, wvb, wob)
    try:
        out = build(pl.Buffered(1))(*args)      # single-buffered weight blocks
    except Exception:
        out = build(None)(*args)                # fall back to default buffering
    return out[:, :L, :] if Lq != L else out


def _reference_mha(q, k, v, wq, wk, wv, wo, *, heads):
    """Pure-JAX reference mirroring the PyTorch forward (eval mode) with the
    same bf16-operand / f32-accumulation policy as the kernel."""
    B, L, D = q.shape
    d_k = D // heads
    bf16, f32 = jnp.bfloat16, jnp.float32

    def proj_split(x, w):
        y = jnp.einsum("bld,dk->blk", x.astype(bf16), w.astype(bf16),
                       preferred_element_type=f32)                 # (B, L, D)
        return y.reshape(B, L, heads, d_k).transpose(0, 2, 1, 3)   # (B,H,L,dk)

    qh, kh, vh = proj_split(q, wq), proj_split(k, wk), proj_split(v, wv)
    s = jnp.einsum("bhqd,bhkd->bhqk", (qh / (d_k ** 0.5)).astype(bf16),
                   kh.astype(bf16), preferred_element_type=f32)
    p = jax.nn.softmax(s, axis=-1)
    attn = jnp.einsum("bhqk,bhkd->bhqd", p.astype(bf16), vh.astype(bf16),
                      preferred_element_type=f32)
    o = attn.transpose(0, 2, 1, 3).reshape(B, L, D)
    return jnp.einsum("bld,dn->bln", o.astype(bf16), wo.astype(bf16),
                      preferred_element_type=f32)


if __name__ == "__main__":
    # Small shapes consistent with the module's forward.
    B, L, d_model, heads = 2, 8, 32, 4
    p_dropout = 0.1  # unused at inference (identity)

    key = jax.random.PRNGKey(0)
    k_q, k_k, k_v, k_wq, k_wk, k_wv, k_wo = jax.random.split(key, 7)

    q = jax.random.normal(k_q, (B, L, d_model), dtype=jnp.float32)
    k = jax.random.normal(k_k, (B, L, d_model), dtype=jnp.float32)
    v = jax.random.normal(k_v, (B, L, d_model), dtype=jnp.float32)

    # Deterministic weight init (stored input-major: y = x @ W).
    scale = 1.0 / (d_model ** 0.5)
    wq = jax.random.uniform(k_wq, (d_model, d_model), jnp.float32, -scale, scale)
    wk = jax.random.uniform(k_wk, (d_model, d_model), jnp.float32, -scale, scale)
    wv = jax.random.uniform(k_wv, (d_model, d_model), jnp.float32, -scale, scale)
    wo = jax.random.uniform(k_wo, (d_model, d_model), jnp.float32, -scale, scale)

    out = multi_head_attention(q, k, v, wq, wk, wv, wo, heads=heads)
    out = jax.block_until_ready(out)

    ref = _reference_mha(q, k, v, wq, wk, wv, wo, heads=heads)
    assert out.shape == (B, L, d_model)
    assert jnp.allclose(out, ref, atol=2e-2, rtol=2e-2), (
        float(jnp.max(jnp.abs(out - ref))))

    print("KERNEL_OK")
</pallas_src>

<mosaic_0001>
module attributes {stable_mosaic.version = 11 : i64} {
  func.func @_mha_kernel(%arg0: i32, %arg1: i32, %arg2: memref<1x8x32xbf16, #tpu.memory_space<vmem>>, %arg3: memref<1x8x32xbf16, #tpu.memory_space<vmem>>, %arg4: memref<1x8x32xbf16, #tpu.memory_space<vmem>>, %arg5: memref<32x32xbf16, #tpu.memory_space<vmem>>, %arg6: memref<32x32xbf16, #tpu.memory_space<vmem>>, %arg7: memref<32x32xbf16, #tpu.memory_space<vmem>>, %arg8: memref<32x32xbf16, #tpu.memory_space<vmem>>, %arg9: memref<1x8x32xf32, #tpu.memory_space<vmem>>, %arg10: memref<8x32xbf16, #tpu.memory_space<vmem>>, %arg11: memref<8x32xbf16, #tpu.memory_space<vmem>>) attributes {dimension_semantics = [#tpu.dimension_semantics<parallel>, #tpu.dimension_semantics<arbitrary>], iteration_bounds = array<i64: 2, 1>, scalar_prefetch = 0 : i64, scratch_operands = 2 : i64, tpu.core_type = #tpu.core_type<tc>, window_params = [{transform_indices = @transform_0, window_bounds = array<i64: 1, 8, 32>}, {transform_indices = @transform_1, window_bounds = array<i64: 1, 8, 32>}, {transform_indices = @transform_2, window_bounds = array<i64: 1, 8, 32>}, {pipeline_mode = #tpu.pipeline_mode<synchronous>, transform_indices = @transform_3, window_bounds = array<i64: 32, 32>}, {pipeline_mode = #tpu.pipeline_mode<synchronous>, transform_indices = @transform_4, window_bounds = array<i64: 32, 32>}, {pipeline_mode = #tpu.pipeline_mode<synchronous>, transform_indices = @transform_5, window_bounds = array<i64: 32, 32>}, {pipeline_mode = #tpu.pipeline_mode<synchronous>, transform_indices = @transform_6, window_bounds = array<i64: 32, 32>}, {transform_indices = @transform_7, window_bounds = array<i64: 1, 8, 32>}]} {
    %c0_i32 = arith.constant 0 : i32
    %0 = arith.cmpi eq, %arg1, %c0_i32 : i32
    %1 = arith.extui %0 : i1 to i32
    %c0_i32_0 = arith.constant 0 : i32
    %2 = arith.cmpi ne, %1, %c0_i32_0 : i32
    scf.if %2 {
      %c0_32 = arith.constant 0 : index
      %c0_33 = arith.constant 0 : index
      %c0_34 = arith.constant 0 : index
      %86 = vector.load %arg3[%c0_32, %c0_33, %c0_34] : memref<1x8x32xbf16, #tpu.memory_space<vmem>>, vector<1x8x32xbf16>
      %87 = vector.shape_cast %86 : vector<1x8x32xbf16> to vector<8x32xbf16>
      %c0_35 = arith.constant 0 : index
      %c0_36 = arith.constant 0 : index
      %88 = vector.load %arg6[%c0_35, %c0_36] : memref<32x32xbf16, #tpu.memory_space<vmem>>, vector<32x32xbf16>
      %cst_37 = arith.constant dense<0.000000e+00> : vector<8x32xf32>
      %89 = tpu.matmul %87, %88, %cst_37 {dimension_numbers = #tpu.dot_dimension_numbers<[1], [0], [0], [1], [0, 0, 1, 1], [], []>} : vector<8x32xbf16>, vector<32x32xbf16>, vector<8x32xf32> -> vector<8x32xf32>
      %c0_38 = arith.constant 0 : index
      %c0_39 = arith.constant 0 : index
      %c0_40 = arith.constant 0 : index
      %90 = vector.load %arg4[%c0_38, %c0_39, %c0_40] : memref<1x8x32xbf16, #tpu.memory_space<vmem>>, vector<1x8x32xbf16>
      %91 = vector.shape_cast %90 : vector<1x8x32xbf16> to vector<8x32xbf16>
      %c0_41 = arith.constant 0 : index
      %c0_42 = arith.constant 0 : index
      %92 = vector.load %arg7[%c0_41, %c0_42] : memref<32x32xbf16, #tpu.memory_space<vmem>>, vector<32x32xbf16>
      %cst_43 = arith.constant dense<0.000000e+00> : vector<8x32xf32>
      %93 = tpu.matmul %91, %92, %cst_43 {dimension_numbers = #tpu.dot_dimension_numbers<[1], [0], [0], [1], [0, 0, 1, 1], [], []>} : vector<8x32xbf16>, vector<32x32xbf16>, vector<8x32xf32> -> vector<8x32xf32>
      %94 = arith.truncf %89 : vector<8x32xf32> to vector<8x32xbf16>
      %c0_44 = arith.constant 0 : index
      %c0_45 = arith.constant 0 : index
      %95 = vector.load %arg10[%c0_44, %c0_45] : memref<8x32xbf16, #tpu.memory_space<vmem>>, vector<8x32xbf16>
      tpu.vector_store %arg10[%c0_44, %c0_45], %94 {strides = array<i32>} : memref<8x32xbf16, #tpu.memory_space<vmem>>, vector<8x32xbf16>,
      %96 = arith.truncf %93 : vector<8x32xf32> to vector<8x32xbf16>
      %c0_46 = arith.constant 0 : index
      %c0_47 = arith.constant 0 : index
      %97 = vector.load %arg11[%c0_46, %c0_47] : memref<8x32xbf16, #tpu.memory_space<vmem>>, vector<8x32xbf16>
      tpu.vector_store %arg11[%c0_46, %c0_47], %96 {strides = array<i32>} : memref<8x32xbf16, #tpu.memory_space<vmem>>, vector<8x32xbf16>,
    } else {
    }
    %c0 = arith.constant 0 : index
    %c0_1 = arith.constant 0 : index
    %c0_2 = arith.constant 0 : index
    %3 = vector.load %arg2[%c0, %c0_1, %c0_2] : memref<1x8x32xbf16, #tpu.memory_space<vmem>>, vector<1x8x32xbf16>
    %4 = vector.shape_cast %3 : vector<1x8x32xbf16> to vector<8x32xbf16>
    %c0_3 = arith.constant 0 : index
    %c0_4 = arith.constant 0 : index
    %5 = vector.load %arg5[%c0_3, %c0_4] : memref<32x32xbf16, #tpu.memory_space<vmem>>, vector<32x32xbf16>
    %cst = arith.constant dense<0.000000e+00> : vector<8x32xf32>
    %6 = tpu.matmul %4, %5, %cst {dimension_numbers = #tpu.dot_dimension_numbers<[1], [0], [0], [1], [0, 0, 1, 1], [], []>} : vector<8x32xbf16>, vector<32x32xbf16>, vector<8x32xf32> -> vector<8x32xf32>
    %cst_5 = arith.constant 0.353553385 : f32
    %7 = vector.broadcast %cst_5 : f32 to vector<8x32xf32>
    %8 = arith.mulf %6, %7 : vector<8x32xf32>
    %9 = arith.truncf %8 : vector<8x32xf32> to vector<8x32xbf16>
    %c0_6 = arith.constant 0 : index
    %c0_7 = arith.constant 0 : index
    %10 = vector.load %arg10[%c0_6, %c0_7] : memref<8x32xbf16, #tpu.memory_space<vmem>>, vector<8x32xbf16>
    %c0_8 = arith.constant 0 : index
    %c0_9 = arith.constant 0 : index
    %11 = vector.load %arg11[%c0_8, %c0_9] : memref<8x32xbf16, #tpu.memory_space<vmem>>, vector<8x32xbf16>
    %12 = vector.extract_strided_slice %9 {offsets = [0, 0], sizes = [8, 8], strides = [1, 1]} : vector<8x32xbf16> to vector<8x8xbf16>
    %13 = vector.extract_strided_slice %10 {offsets = [0, 0], sizes = [8, 8], strides = [1, 1]} : vector<8x32xbf16> to vector<8x8xbf16>
    %14 = vector.extract_strided_slice %11 {offsets = [0, 0], sizes = [8, 8], strides = [1, 1]} : vector<8x32xbf16> to vector<8x8xbf16>
    %cst_10 = arith.constant dense<0.000000e+00> : vector<8x8xf32>
    %15 = tpu.matmul %12, %13, %cst_10 {dimension_numbers = #tpu.dot_dimension_numbers<[1], [1], [0], [0], [0, 0, 1, 0], [], []>} : vector<8x8xbf16>, vector<8x8xbf16>, vector<8x8xf32> -> vector<8x8xf32>
    %cst_11 = arith.constant dense<0xFF800000> : vector<8xf32>
    %16 = vector.multi_reduction <maximumf>, %15, %cst_11 [1] : vector<8x8xf32> to vector<8xf32>
    %17 = vector.shape_cast %16 : vector<8xf32> to vector<8x1xf32>
    %18 = vector.broadcast %17 : vector<8x1xf32> to vector<8x8xf32>
    %19 = arith.subf %15, %18 : vector<8x8xf32>
    %20 = math.exp %19 : vector<8x8xf32>
    %cst_12 = arith.constant dense<0.000000e+00> : vector<8xf32>
    %21 = vector.multi_reduction <add>, %20, %cst_12 [1] : vector<8x8xf32> to vector<8xf32>
    %22 = vector.shape_cast %21 : vector<8xf32> to vector<8x1xf32>
    %23 = tpu.reciprocal %22 {approx = true} : vector<8x1xf32> -> vector<8x1xf32>
    %24 = vector.broadcast %23 : vector<8x1xf32> to vector<8x8xf32>
    %25 = arith.mulf %20, %24 : vector<8x8xf32>
    %26 = arith.truncf %25 : vector<8x8xf32> to vector<8x8xbf16>
    %cst_13 = arith.constant dense<0.000000e+00> : vector<8x8xf32>
    %27 = tpu.matmul %26, %14, %cst_13 {dimension_numbers = #tpu.dot_dimension_numbers<[1], [0], [0], [1], [0, 0, 1, 1], [], []>} : vector<8x8xbf16>, vector<8x8xbf16>, vector<8x8xf32> -> vector<8x8xf32>
    %28 = arith.truncf %27 : vector<8x8xf32> to vector<8x8xbf16>
    %29 = vector.extract_strided_slice %9 {offsets = [0, 8], sizes = [8, 8], strides = [1, 1]} : vector<8x32xbf16> to vector<8x8xbf16>
    %30 = vector.extract_strided_slice %10 {offsets = [0, 8], sizes = [8, 8], strides = [1, 1]} : vector<8x32xbf16> to vector<8x8xbf16>
    %31 = vector.extract_strided_slice %11 {offsets = [0, 8], sizes = [8, 8], strides = [1, 1]} : vector<8x32xbf16> to vector<8x8xbf16>
    %cst_14 = arith.constant dense<0.000000e+00> : vector<8x8xf32>
    %32 = tpu.matmul %29, %30, %cst_14 {dimension_numbers = #tpu.dot_dimension_numbers<[1], [1], [0], [0], [0, 0, 1, 0], [], []>} : vector<8x8xbf16>, vector<8x8xbf16>, vector<8x8xf32> -> vector<8x8xf32>
    %cst_15 = arith.constant dense<0xFF800000> : vector<8xf32>
    %33 = vector.multi_reduction <maximumf>, %32, %cst_15 [1] : vector<8x8xf32> to vector<8xf32>
    %34 = vector.shape_cast %33 : vector<8xf32> to vector<8x1xf32>
    %35 = vector.broadcast %34 : vector<8x1xf32> to vector<8x8xf32>
    %36 = arith.subf %32, %35 : vector<8x8xf32>
    %37 = math.exp %36 : vector<8x8xf32>
    %cst_16 = arith.constant dense<0.000000e+00> : vector<8xf32>
    %38 = vector.multi_reduction <add>, %37, %cst_16 [1] : vector<8x8xf32> to vector<8xf32>
    %39 = vector.shape_cast %38 : vector<8xf32> to vector<8x1xf32>
    %40 = tpu.reciprocal %39 {approx = true} : vector<8x1xf32> -> vector<8x1xf32>
    %41 = vector.broadcast %40 : vector<8x1xf32> to vector<8x8xf32>
    %42 = arith.mulf %37, %41 : vector<8x8xf32>
    %43 = arith.truncf %42 : vector<8x8xf32> to vector<8x8xbf16>
    %cst_17 = arith.constant dense<0.000000e+00> : vector<8x8xf32>
    %44 = tpu.matmul %43, %31, %cst_17 {dimension_numbers = #tpu.dot_dimension_numbers<[1], [0], [0], [1], [0, 0, 1, 1], [], []>} : vector<8x8xbf16>, vector<8x8xbf16>, vector<8x8xf32> -> vector<8x8xf32>
    %45 = arith.truncf %44 : vector<8x8xf32> to vector<8x8xbf16>
    %46 = vector.extract_strided_slice %9 {offsets = [0, 16], sizes = [8, 8], strides = [1, 1]} : vector<8x32xbf16> to vector<8x8xbf16>
    %47 = vector.extract_strided_slice %10 {offsets = [0, 16], sizes = [8, 8], strides = [1, 1]} : vector<8x32xbf16> to vector<8x8xbf16>
    %48 = vector.extract_strided_slice %11 {offsets = [0, 16], sizes = [8, 8], strides = [1, 1]} : vector<8x32xbf16> to vector<8x8xbf16>
    %cst_18 = arith.constant dense<0.000000e+00> : vector<8x8xf32>
    %49 = tpu.matmul %46, %47, %cst_18 {dimension_numbers = #tpu.dot_dimension_numbers<[1], [1], [0], [0], [0, 0, 1, 0], [], []>} : vector<8x8xbf16>, vector<8x8xbf16>, vector<8x8xf32> -> vector<8x8xf32>
    %cst_19 = arith.constant dense<0xFF800000> : vector<8xf32>
    %50 = vector.multi_reduction <maximumf>, %49, %cst_19 [1] : vector<8x8xf32> to vector<8xf32>
    %51 = vector.shape_cast %50 : vector<8xf32> to vector<8x1xf32>
    %52 = vector.broadcast %51 : vector<8x1xf32> to vector<8x8xf32>
    %53 = arith.subf %49, %52 : vector<8x8xf32>
    %54 = math.exp %53 : vector<8x8xf32>
    %cst_20 = arith.constant dense<0.000000e+00> : vector<8xf32>
    %55 = vector.multi_reduction <add>, %54, %cst_20 [1] : vector<8x8xf32> to vector<8xf32>
    %56 = vector.shape_cast %55 : vector<8xf32> to vector<8x1xf32>
    %57 = tpu.reciprocal %56 {approx = true} : vector<8x1xf32> -> vector<8x1xf32>
    %58 = vector.broadcast %57 : vector<8x1xf32> to vector<8x8xf32>
    %59 = arith.mulf %54, %58 : vector<8x8xf32>
    %60 = arith.truncf %59 : vector<8x8xf32> to vector<8x8xbf16>
    %cst_21 = arith.constant dense<0.000000e+00> : vector<8x8xf32>
    %61 = tpu.matmul %60, %48, %cst_21 {dimension_numbers = #tpu.dot_dimension_numbers<[1], [0], [0], [1], [0, 0, 1, 1], [], []>} : vector<8x8xbf16>, vector<8x8xbf16>, vector<8x8xf32> -> vector<8x8xf32>
    %62 = arith.truncf %61 : vector<8x8xf32> to vector<8x8xbf16>
    %63 = vector.extract_strided_slice %9 {offsets = [0, 24], sizes = [8, 8], strides = [1, 1]} : vector<8x32xbf16> to vector<8x8xbf16>
    %64 = vector.extract_strided_slice %10 {offsets = [0, 24], sizes = [8, 8], strides = [1, 1]} : vector<8x32xbf16> to vector<8x8xbf16>
    %65 = vector.extract_strided_slice %11 {offsets = [0, 24], sizes = [8, 8], strides = [1, 1]} : vector<8x32xbf16> to vector<8x8xbf16>
    %cst_22 = arith.constant dense<0.000000e+00> : vector<8x8xf32>
    %66 = tpu.matmul %63, %64, %cst_22 {dimension_numbers = #tpu.dot_dimension_numbers<[1], [1], [0], [0], [0, 0, 1, 0], [], []>} : vector<8x8xbf16>, vector<8x8xbf16>, vector<8x8xf32> -> vector<8x8xf32>
    %cst_23 = arith.constant dense<0xFF800000> : vector<8xf32>
    %67 = vector.multi_reduction <maximumf>, %66, %cst_23 [1] : vector<8x8xf32> to vector<8xf32>
    %68 = vector.shape_cast %67 : vector<8xf32> to vector<8x1xf32>
    %69 = vector.broadcast %68 : vector<8x1xf32> to vector<8x8xf32>
    %70 = arith.subf %66, %69 : vector<8x8xf32>
    %71 = math.exp %70 : vector<8x8xf32>
    %cst_24 = arith.constant dense<0.000000e+00> : vector<8xf32>
    %72 = vector.multi_reduction <add>, %71, %cst_24 [1] : vector<8x8xf32> to vector<8xf32>
    %73 = vector.shape_cast %72 : vector<8xf32> to vector<8x1xf32>
    %74 = tpu.reciprocal %73 {approx = true} : vector<8x1xf32> -> vector<8x1xf32>
    %75 = vector.broadcast %74 : vector<8x1xf32> to vector<8x8xf32>
    %76 = arith.mulf %71, %75 : vector<8x8xf32>
    %77 = arith.truncf %76 : vector<8x8xf32> to vector<8x8xbf16>
    %cst_25 = arith.constant dense<0.000000e+00> : vector<8x8xf32>
    %78 = tpu.matmul %77, %65, %cst_25 {dimension_numbers = #tpu.dot_dimension_numbers<[1], [0], [0], [1], [0, 0, 1, 1], [], []>} : vector<8x8xbf16>, vector<8x8xbf16>, vector<8x8xf32> -> vector<8x8xf32>
    %79 = arith.truncf %78 : vector<8x8xf32> to vector<8x8xbf16>
    %80 = tpu.concatenate %28, %45, %62, %79 in 1 : vector<8x8xbf16>, vector<8x8xbf16>, vector<8x8xbf16>, vector<8x8xbf16> -> vector<8x32xbf16>
    %c0_26 = arith.constant 0 : index
    %c0_27 = arith.constant 0 : index
    %81 = vector.load %arg8[%c0_26, %c0_27] : memref<32x32xbf16, #tpu.memory_space<vmem>>, vector<32x32xbf16>
    %cst_28 = arith.constant dense<0.000000e+00> : vector<8x32xf32>
    %82 = tpu.matmul %80, %81, %cst_28 {dimension_numbers = #tpu.dot_dimension_numbers<[1], [0], [0], [1], [0, 0, 1, 1], [], []>} : vector<8x32xbf16>, vector<32x32xbf16>, vector<8x32xf32> -> vector<8x32xf32>
    %c0_29 = arith.constant 0 : index
    %c0_30 = arith.constant 0 : index
    %c0_31 = arith.constant 0 : index
    %83 = vector.load %arg9[%c0_29, %c0_30, %c0_31] : memref<1x8x32xf32, #tpu.memory_space<vmem>>, vector<1x8x32xf32>
    %84 = vector.shape_cast %83 : vector<1x8x32xf32> to vector<8x32xf32>
    %85 = vector.shape_cast %82 : vector<8x32xf32> to vector<1x8x32xf32>
    tpu.vector_store %arg9[%c0_29, %c0_30, %c0_31], %85 {strides = array<i32>} : memref<1x8x32xf32, #tpu.memory_space<vmem>>, vector<1x8x32xf32>,
    return
  }
  func.func @transform_0(%arg0: i32, %arg1: i32) -> (i32, i32, i32) {
    %c0_i32 = arith.constant 0 : i32
    %c0_i32_0 = arith.constant 0 : i32
    return %arg0, %arg1, %c0_i32 : i32, i32, i32
  }
  func.func @transform_1(%arg0: i32, %arg1: i32) -> (i32, i32, i32) {
    %c0_i32 = arith.constant 0 : i32
    %c0_i32_0 = arith.constant 0 : i32
    %c0_i32_1 = arith.constant 0 : i32
    return %arg0, %c0_i32, %c0_i32_0 : i32, i32, i32
  }
  func.func @transform_2(%arg0: i32, %arg1: i32) -> (i32, i32, i32) {
    %c0_i32 = arith.constant 0 : i32
    %c0_i32_0 = arith.constant 0 : i32
    %c0_i32_1 = arith.constant 0 : i32
    return %arg0, %c0_i32, %c0_i32_0 : i32, i32, i32
  }
  func.func @transform_3(%arg0: i32, %arg1: i32) -> (i32, i32) {
    %c0_i32 = arith.constant 0 : i32
    %c0_i32_0 = arith.constant 0 : i32
    %c0_i32_1 = arith.constant 0 : i32
    return %c0_i32, %c0_i32_0 : i32, i32
  }
  func.func @transform_4(%arg0: i32, %arg1: i32) -> (i32, i32) {
    %c0_i32 = arith.constant 0 : i32
    %c0_i32_0 = arith.constant 0 : i32
    %c0_i32_1 = arith.constant 0 : i32
    return %c0_i32, %c0_i32_0 : i32, i32
  }
  func.func @transform_5(%arg0: i32, %arg1: i32) -> (i32, i32) {
    %c0_i32 = arith.constant 0 : i32
    %c0_i32_0 = arith.constant 0 : i32
    %c0_i32_1 = arith.constant 0 : i32
    return %c0_i32, %c0_i32_0 : i32, i32
  }
  func.func @transform_6(%arg0: i32, %arg1: i32) -> (i32, i32) {
    %c0_i32 = arith.constant 0 : i32
    %c0_i32_0 = arith.constant 0 : i32
    %c0_i32_1 = arith.constant 0 : i32
    return %c0_i32, %c0_i32_0 : i32, i32
  }
  func.func @transform_7(%arg0: i32, %arg1: i32) -> (i32, i32, i32) {
    %c0_i32 = arith.constant 0 : i32
    %c0_i32_0 = arith.constant 0 : i32
    return %arg0, %arg1, %c0_i32 : i32, i32, i32
  }
}

module attributes {stable_mosaic.version = 11 : i64} {
  func.func @_mha_kernel(%arg0: i32, %arg1: i32, %arg2: memref<1x8x32xbf16, #tpu.memory_space<vmem>>, %arg3: memref<1x8x32xbf16, #tpu.memory_space<vmem>>, %arg4: memref<1x8x32xbf16, #tpu.memory_space<vmem>>, %arg5: memref<32x32xbf16, #tpu.memory_space<vmem>>, %arg6: memref<32x32xbf16, #tpu.memory_space<vmem>>, %arg7: memref<32x32xbf16, #tpu.memory_space<vmem>>, %arg8: memref<32x32xbf16, #tpu.memory_space<vmem>>, %arg9: memref<1x8x32xf32, #tpu.memory_space<vmem>>, %arg10: memref<8x32xbf16, #tpu.memory_space<vmem>>, %arg11: memref<8x32xbf16, #tpu.memory_space<vmem>>) attributes {dimension_semantics = [#tpu.dimension_semantics<parallel>, #tpu.dimension_semantics<arbitrary>], iteration_bounds = array<i64: 2, 1>, scalar_prefetch = 0 : i64, scratch_operands = 2 : i64, tpu.core_type = #tpu.core_type<tc>, window_params = [{transform_indices = @transform_0, window_bounds = array<i64: 1, 8, 32>}, {transform_indices = @transform_1, window_bounds = array<i64: 1, 8, 32>}, {transform_indices = @transform_2, window_bounds = array<i64: 1, 8, 32>}, {pipeline_mode = #tpu.pipeline_mode<synchronous>, transform_indices = @transform_3, window_bounds = array<i64: 32, 32>}, {pipeline_mode = #tpu.pipeline_mode<synchronous>, transform_indices = @transform_4, window_bounds = array<i64: 32, 32>}, {pipeline_mode = #tpu.pipeline_mode<synchronous>, transform_indices = @transform_5, window_bounds = array<i64: 32, 32>}, {pipeline_mode = #tpu.pipeline_mode<synchronous>, transform_indices = @transform_6, window_bounds = array<i64: 32, 32>}, {transform_indices = @transform_7, window_bounds = array<i64: 1, 8, 32>}]} {
    %c0_i32 = arith.constant 0 : i32
    %0 = arith.cmpi eq, %arg1, %c0_i32 : i32
    %1 = arith.extui %0 : i1 to i32
    %c0_i32_0 = arith.constant 0 : i32
    %2 = arith.cmpi ne, %1, %c0_i32_0 : i32
    scf.if %2 {
      %c0_32 = arith.constant 0 : index
      %c0_33 = arith.constant 0 : index
      %c0_34 = arith.constant 0 : index
      %86 = vector.load %arg3[%c0_32, %c0_33, %c0_34] : memref<1x8x32xbf16, #tpu.memory_space<vmem>>, vector<1x8x32xbf16>
      %87 = vector.shape_cast %86 : vector<1x8x32xbf16> to vector<8x32xbf16>
      %c0_35 = arith.constant 0 : index
      %c0_36 = arith.constant 0 : index
      %88 = vector.load %arg6[%c0_35, %c0_36] : memref<32x32xbf16, #tpu.memory_space<vmem>>, vector<32x32xbf16>
      %cst_37 = arith.constant dense<0.000000e+00> : vector<8x32xf32>
      %89 = tpu.matmul %87, %88, %cst_37 {dimension_numbers = #tpu.dot_dimension_numbers<[1], [0], [0], [1], [0, 0, 1, 1], [], []>} : vector<8x32xbf16>, vector<32x32xbf16>, vector<8x32xf32> -> vector<8x32xf32>
      %c0_38 = arith.constant 0 : index
      %c0_39 = arith.constant 0 : index
      %c0_40 = arith.constant 0 : index
      %90 = vector.load %arg4[%c0_38, %c0_39, %c0_40] : memref<1x8x32xbf16, #tpu.memory_space<vmem>>, vector<1x8x32xbf16>
      %91 = vector.shape_cast %90 : vector<1x8x32xbf16> to vector<8x32xbf16>
      %c0_41 = arith.constant 0 : index
      %c0_42 = arith.constant 0 : index
      %92 = vector.load %arg7[%c0_41, %c0_42] : memref<32x32xbf16, #tpu.memory_space<vmem>>, vector<32x32xbf16>
      %cst_43 = arith.constant dense<0.000000e+00> : vector<8x32xf32>
      %93 = tpu.matmul %91, %92, %cst_43 {dimension_numbers = #tpu.dot_dimension_numbers<[1], [0], [0], [1], [0, 0, 1, 1], [], []>} : vector<8x32xbf16>, vector<32x32xbf16>, vector<8x32xf32> -> vector<8x32xf32>
      %94 = arith.truncf %89 : vector<8x32xf32> to vector<8x32xbf16>
      %c0_44 = arith.constant 0 : index
      %c0_45 = arith.constant 0 : index
      %95 = vector.load %arg10[%c0_44, %c0_45] : memref<8x32xbf16, #tpu.memory_space<vmem>>, vector<8x32xbf16>
      tpu.vector_store %arg10[%c0_44, %c0_45], %94 {strides = array<i32>} : memref<8x32xbf16, #tpu.memory_space<vmem>>, vector<8x32xbf16>,
      %96 = arith.truncf %93 : vector<8x32xf32> to vector<8x32xbf16>
      %c0_46 = arith.constant 0 : index
      %c0_47 = arith.constant 0 : index
      %97 = vector.load %arg11[%c0_46, %c0_47] : memref<8x32xbf16, #tpu.memory_space<vmem>>, vector<8x32xbf16>
      tpu.vector_store %arg11[%c0_46, %c0_47], %96 {strides = array<i32>} : memref<8x32xbf16, #tpu.memory_space<vmem>>, vector<8x32xbf16>,
    } else {
    }
    %c0 = arith.constant 0 : index
    %c0_1 = arith.constant 0 : index
    %c0_2 = arith.constant 0 : index
    %3 = vector.load %arg2[%c0, %c0_1, %c0_2] : memref<1x8x32xbf16, #tpu.memory_space<vmem>>, vector<1x8x32xbf16>
    %4 = vector.shape_cast %3 : vector<1x8x32xbf16> to vector<8x32xbf16>
    %c0_3 = arith.constant 0 : index
    %c0_4 = arith.constant 0 : index
    %5 = vector.load %arg5[%c0_3, %c0_4] : memref<32x32xbf16, #tpu.memory_space<vmem>>, vector<32x32xbf16>
    %cst = arith.constant dense<0.000000e+00> : vector<8x32xf32>
    %6 = tpu.matmul %4, %5, %cst {dimension_numbers = #tpu.dot_dimension_numbers<[1], [0], [0], [1], [0, 0, 1, 1], [], []>} : vector<8x32xbf16>, vector<32x32xbf16>, vector<8x32xf32> -> vector<8x32xf32>
    %cst_5 = arith.constant 0.353553385 : f32
    %7 = vector.broadcast %cst_5 : f32 to vector<8x32xf32>
    %8 = arith.mulf %6, %7 : vector<8x32xf32>
    %9 = arith.truncf %8 : vector<8x32xf32> to vector<8x32xbf16>
    %c0_6 = arith.constant 0 : index
    %c0_7 = arith.constant 0 : index
    %10 = vector.load %arg10[%c0_6, %c0_7] : memref<8x32xbf16, #tpu.memory_space<vmem>>, vector<8x32xbf16>
    %c0_8 = arith.constant 0 : index
    %c0_9 = arith.constant 0 : index
    %11 = vector.load %arg11[%c0_8, %c0_9] : memref<8x32xbf16, #tpu.memory_space<vmem>>, vector<8x32xbf16>
    %12 = vector.extract_strided_slice %9 {offsets = [0, 0], sizes = [8, 8], strides = [1, 1]} : vector<8x32xbf16> to vector<8x8xbf16>
    %13 = vector.extract_strided_slice %10 {offsets = [0, 0], sizes = [8, 8], strides = [1, 1]} : vector<8x32xbf16> to vector<8x8xbf16>
    %14 = vector.extract_strided_slice %11 {offsets = [0, 0], sizes = [8, 8], strides = [1, 1]} : vector<8x32xbf16> to vector<8x8xbf16>
    %cst_10 = arith.constant dense<0.000000e+00> : vector<8x8xf32>
    %15 = tpu.matmul %12, %13, %cst_10 {dimension_numbers = #tpu.dot_dimension_numbers<[1], [1], [0], [0], [0, 0, 1, 0], [], []>} : vector<8x8xbf16>, vector<8x8xbf16>, vector<8x8xf32> -> vector<8x8xf32>
    %cst_11 = arith.constant dense<0xFF800000> : vector<8xf32>
    %16 = vector.multi_reduction <maximumf>, %15, %cst_11 [1] : vector<8x8xf32> to vector<8xf32>
    %17 = vector.shape_cast %16 : vector<8xf32> to vector<8x1xf32>
    %18 = vector.broadcast %17 : vector<8x1xf32> to vector<8x8xf32>
    %19 = arith.subf %15, %18 : vector<8x8xf32>
    %20 = math.exp %19 : vector<8x8xf32>
    %cst_12 = arith.constant dense<0.000000e+00> : vector<8xf32>
    %21 = vector.multi_reduction <add>, %20, %cst_12 [1] : vector<8x8xf32> to vector<8xf32>
    %22 = vector.shape_cast %21 : vector<8xf32> to vector<8x1xf32>
    %23 = tpu.reciprocal %22 {approx = true} : vector<8x1xf32> -> vector<8x1xf32>
    %24 = vector.broadcast %23 : vector<8x1xf32> to vector<8x8xf32>
    %25 = arith.mulf %20, %24 : vector<8x8xf32>
    %26 = arith.truncf %25 : vector<8x8xf32> to vector<8x8xbf16>
    %cst_13 = arith.constant dense<0.000000e+00> : vector<8x8xf32>
    %27 = tpu.matmul %26, %14, %cst_13 {dimension_numbers = #tpu.dot_dimension_numbers<[1], [0], [0], [1], [0, 0, 1, 1], [], []>} : vector<8x8xbf16>, vector<8x8xbf16>, vector<8x8xf32> -> vector<8x8xf32>
    %28 = arith.truncf %27 : vector<8x8xf32> to vector<8x8xbf16>
    %29 = vector.extract_strided_slice %9 {offsets = [0, 8], sizes = [8, 8], strides = [1, 1]} : vector<8x32xbf16> to vector<8x8xbf16>
    %30 = vector.extract_strided_slice %10 {offsets = [0, 8], sizes = [8, 8], strides = [1, 1]} : vector<8x32xbf16> to vector<8x8xbf16>
    %31 = vector.extract_strided_slice %11 {offsets = [0, 8], sizes = [8, 8], strides = [1, 1]} : vector<8x32xbf16> to vector<8x8xbf16>
    %cst_14 = arith.constant dense<0.000000e+00> : vector<8x8xf32>
    %32 = tpu.matmul %29, %30, %cst_14 {dimension_numbers = #tpu.dot_dimension_numbers<[1], [1], [0], [0], [0, 0, 1, 0], [], []>} : vector<8x8xbf16>, vector<8x8xbf16>, vector<8x8xf32> -> vector<8x8xf32>
    %cst_15 = arith.constant dense<0xFF800000> : vector<8xf32>
    %33 = vector.multi_reduction <maximumf>, %32, %cst_15 [1] : vector<8x8xf32> to vector<8xf32>
    %34 = vector.shape_cast %33 : vector<8xf32> to vector<8x1xf32>
    %35 = vector.broadcast %34 : vector<8x1xf32> to vector<8x8xf32>
    %36 = arith.subf %32, %35 : vector<8x8xf32>
    %37 = math.exp %36 : vector<8x8xf32>
    %cst_16 = arith.constant dense<0.000000e+00> : vector<8xf32>
    %38 = vector.multi_reduction <add>, %37, %cst_16 [1] : vector<8x8xf32> to vector<8xf32>
    %39 = vector.shape_cast %38 : vector<8xf32> to vector<8x1xf32>
    %40 = tpu.reciprocal %39 {approx = true} : vector<8x1xf32> -> vector<8x1xf32>
    %41 = vector.broadcast %40 : vector<8x1xf32> to vector<8x8xf32>
    %42 = arith.mulf %37, %41 : vector<8x8xf32>
    %43 = arith.truncf %42 : vector<8x8xf32> to vector<8x8xbf16>
    %cst_17 = arith.constant dense<0.000000e+00> : vector<8x8xf32>
    %44 = tpu.matmul %43, %31, %cst_17 {dimension_numbers = #tpu.dot_dimension_numbers<[1], [0], [0], [1], [0, 0, 1, 1], [], []>} : vector<8x8xbf16>, vector<8x8xbf16>, vector<8x8xf32> -> vector<8x8xf32>
    %45 = arith.truncf %44 : vector<8x8xf32> to vector<8x8xbf16>
    %46 = vector.extract_strided_slice %9 {offsets = [0, 16], sizes = [8, 8], strides = [1, 1]} : vector<8x32xbf16> to vector<8x8xbf16>
    %47 = vector.extract_strided_slice %10 {offsets = [0, 16], sizes = [8, 8], strides = [1, 1]} : vector<8x32xbf16> to vector<8x8xbf16>
    %48 = vector.extract_strided_slice %11 {offsets = [0, 16], sizes = [8, 8], strides = [1, 1]} : vector<8x32xbf16> to vector<8x8xbf16>
    %cst_18 = arith.constant dense<0.000000e+00> : vector<8x8xf32>
    %49 = tpu.matmul %46, %47, %cst_18 {dimension_numbers = #tpu.dot_dimension_numbers<[1], [1], [0], [0], [0, 0, 1, 0], [], []>} : vector<8x8xbf16>, vector<8x8xbf16>, vector<8x8xf32> -> vector<8x8xf32>
    %cst_19 = arith.constant dense<0xFF800000> : vector<8xf32>
    %50 = vector.multi_reduction <maximumf>, %49, %cst_19 [1] : vector<8x8xf32> to vector<8xf32>
    %51 = vector.shape_cast %50 : vector<8xf32> to vector<8x1xf32>
    %52 = vector.broadcast %51 : vector<8x1xf32> to vector<8x8xf32>
    %53 = arith.subf %49, %52 : vector<8x8xf32>
    %54 = math.exp %53 : vector<8x8xf32>
    %cst_20 = arith.constant dense<0.000000e+00> : vector<8xf32>
    %55 = vector.multi_reduction <add>, %54, %cst_20 [1] : vector<8x8xf32> to vector<8xf32>
    %56 = vector.shape_cast %55 : vector<8xf32> to vector<8x1xf32>
    %57 = tpu.reciprocal %56 {approx = true} : vector<8x1xf32> -> vector<8x1xf32>
    %58 = vector.broadcast %57 : vector<8x1xf32> to vector<8x8xf32>
    %59 = arith.mulf %54, %58 : vector<8x8xf32>
    %60 = arith.truncf %59 : vector<8x8xf32> to vector<8x8xbf16>
    %cst_21 = arith.constant dense<0.000000e+00> : vector<8x8xf32>
    %61 = tpu.matmul %60, %48, %cst_21 {dimension_numbers = #tpu.dot_dimension_numbers<[1], [0], [0], [1], [0, 0, 1, 1], [], []>} : vector<8x8xbf16>, vector<8x8xbf16>, vector<8x8xf32> -> vector<8x8xf32>
    %62 = arith.truncf %61 : vector<8x8xf32> to vector<8x8xbf16>
    %63 = vector.extract_strided_slice %9 {offsets = [0, 24], sizes = [8, 8], strides = [1, 1]} : vector<8x32xbf16> to vector<8x8xbf16>
    %64 = vector.extract_strided_slice %10 {offsets = [0, 24], sizes = [8, 8], strides = [1, 1]} : vector<8x32xbf16> to vector<8x8xbf16>
    %65 = vector.extract_strided_slice %11 {offsets = [0, 24], sizes = [8, 8], strides = [1, 1]} : vector<8x32xbf16> to vector<8x8xbf16>
    %cst_22 = arith.constant dense<0.000000e+00> : vector<8x8xf32>
    %66 = tpu.matmul %63, %64, %cst_22 {dimension_numbers = #tpu.dot_dimension_numbers<[1], [1], [0], [0], [0, 0, 1, 0], [], []>} : vector<8x8xbf16>, vector<8x8xbf16>, vector<8x8xf32> -> vector<8x8xf32>
    %cst_23 = arith.constant dense<0xFF800000> : vector<8xf32>
    %67 = vector.multi_reduction <maximumf>, %66, %cst_23 [1] : vector<8x8xf32> to vector<8xf32>
    %68 = vector.shape_cast %67 : vector<8xf32> to vector<8x1xf32>
    %69 = vector.broadcast %68 : vector<8x1xf32> to vector<8x8xf32>
    %70 = arith.subf %66, %69 : vector<8x8xf32>
    %71 = math.exp %70 : vector<8x8xf32>
    %cst_24 = arith.constant dense<0.000000e+00> : vector<8xf32>
    %72 = vector.multi_reduction <add>, %71, %cst_24 [1] : vector<8x8xf32> to vector<8xf32>
    %73 = vector.shape_cast %72 : vector<8xf32> to vector<8x1xf32>
    %74 = tpu.reciprocal %73 {approx = true} : vector<8x1xf32> -> vector<8x1xf32>
    %75 = vector.broadcast %74 : vector<8x1xf32> to vector<8x8xf32>
    %76 = arith.mulf %71, %75 : vector<8x8xf32>
    %77 = arith.truncf %76 : vector<8x8xf32> to vector<8x8xbf16>
    %cst_25 = arith.constant dense<0.000000e+00> : vector<8x8xf32>
    %78 = tpu.matmul %77, %65, %cst_25 {dimension_numbers = #tpu.dot_dimension_numbers<[1], [0], [0], [1], [0, 0, 1, 1], [], []>} : vector<8x8xbf16>, vector<8x8xbf16>, vector<8x8xf32> -> vector<8x8xf32>
    %79 = arith.truncf %78 : vector<8x8xf32> to vector<8x8xbf16>
    %80 = tpu.concatenate %28, %45, %62, %79 in 1 : vector<8x8xbf16>, vector<8x8xbf16>, vector<8x8xbf16>, vector<8x8xbf16> -> vector<8x32xbf16>
    %c0_26 = arith.constant 0 : index
    %c0_27 = arith.constant 0 : index
    %81 = vector.load %arg8[%c0_26, %c0_27] : memref<32x32xbf16, #tpu.memory_space<vmem>>, vector<32x32xbf16>
    %cst_28 = arith.constant dense<0.000000e+00> : vector<8x32xf32>
    %82 = tpu.matmul %80, %81, %cst_28 {dimension_numbers = #tpu.dot_dimension_numbers<[1], [0], [0], [1], [0, 0, 1, 1], [], []>} : vector<8x32xbf16>, vector<32x32xbf16>, vector<8x32xf32> -> vector<8x32xf32>
    %c0_29 = arith.constant 0 : index
    %c0_30 = arith.constant 0 : index
    %c0_31 = arith.constant 0 : index
    %83 = vector.load %arg9[%c0_29, %c0_30, %c0_31] : memref<1x8x32xf32, #tpu.memory_space<vmem>>, vector<1x8x32xf32>
    %84 = vector.shape_cast %83 : vector<1x8x32xf32> to vector<8x32xf32>
    %85 = vector.shape_cast %82 : vector<8x32xf32> to vector<1x8x32xf32>
    tpu.vector_store %arg9[%c0_29, %c0_30, %c0_31], %85 {strides = array<i32>} : memref<1x8x32xf32, #tpu.memory_space<vmem>>, vector<1x8x32xf32>,
    return
  }
  func.func @transform_0(%arg0: i32, %arg1: i32) -> (i32, i32, i32) {
    %c0_i32 = arith.constant 0 : i32
    %c0_i32_0 = arith.constant 0 : i32
    return %arg0, %arg1, %c0_i32 : i32, i32, i32
  }
  func.func @transform_1(%arg0: i32, %arg1: i32) -> (i32, i32, i32) {
    %c0_i32 = arith.constant 0 : i32
    %c0_i32_0 = arith.constant 0 : i32
    %c0_i32_1 = arith.constant 0 : i32
    return %arg0, %c0_i32, %c0_i32_0 : i32, i32, i32
  }
  func.func @transform_2(%arg0: i32, %arg1: i32) -> (i32, i32, i32) {
    %c0_i32 = arith.constant 0 : i32
    %c0_i32_0 = arith.constant 0 : i32
    %c0_i32_1 = arith.constant 0 : i32
    return %arg0, %c0_i32, %c0_i32_0 : i32, i32, i32
  }
  func.func @transform_3(%arg0: i32, %arg1: i32) -> (i32, i32) {
    %c0_i32 = arith.constant 0 : i32
    %c0_i32_0 = arith.constant 0 : i32
    %c0_i32_1 = arith.constant 0 : i32
    return %c0_i32, %c0_i32_0 : i32, i32
  }
  func.func @transform_4(%arg0: i32, %arg1: i32) -> (i32, i32) {
    %c0_i32 = arith.constant 0 : i32
    %c0_i32_0 = arith.constant 0 : i32
    %c0_i32_1 = arith.constant 0 : i32
    return %c0_i32, %c0_i32_0 : i32, i32
  }
  func.func @transform_5(%arg0: i32, %arg1: i32) -> (i32, i32) {
    %c0_i32 = arith.constant 0 : i32
    %c0_i32_0 = arith.constant 0 : i32
    %c0_i32_1 = arith.constant 0 : i32
    return %c0_i32, %c0_i32_0 : i32, i32
  }
  func.func @transform_6(%arg0: i32, %arg1: i32) -> (i32, i32) {
    %c0_i32 = arith.constant 0 : i32
    %c0_i32_0 = arith.constant 0 : i32
    %c0_i32_1 = arith.constant 0 : i32
    return %c0_i32, %c0_i32_0 : i32, i32
  }
  func.func @transform_7(%arg0: i32, %arg1: i32) -> (i32, i32, i32) {
    %c0_i32 = arith.constant 0 : i32
    %c0_i32_0 = arith.constant 0 : i32
    return %arg0, %arg1, %c0_i32 : i32, i32, i32
  }
}

</mosaic_0001>

<bundles_post_ra>
// kernel: tpu_custom_call.1
= control target key start
LH: loop header
LB: loop body
LE: loop exit
PB: predicated region body
PF: predicated region fallthrough
CT: control target
= control target key end

     0   :  { %s2337_s0 = inlined_call_operand.hbm [shape: bf16[2,8,32], index: 0, kind: input, shape index: {}]   ;;  %s2338_s1 = inlined_call_operand.hbm [shape: bf16[2,8,32], index: 1, kind: input, shape index: {}]   ;;  %s2339_s2 = inlined_call_operand.hbm [shape: bf16[2,8,32], index: 2, kind: input, shape index: {}]   ;;  %s2340_s3 = inlined_call_operand.hbm [shape: bf16[32,32], index: 3, kind: input, shape index: {}]   ;;  %s2341_s4 = inlined_call_operand.hbm [shape: bf16[32,32], index: 4, kind: input, shape index: {}]   ;;  %s2342_s5 = inlined_call_operand.hbm [shape: bf16[32,32], index: 5, kind: input, shape index: {}]   ;;  %s2343_s6 = inlined_call_operand.hbm [shape: bf16[32,32], index: 6, kind: input, shape index: {}]   ;;  %s2344_s7 = inlined_call_operand.hbm [shape: f32[2,8,32], index: 7, kind: output, shape index: {}]  }
   0x1   :  { %2359 = sst [smem:[#allocation27_spill]] %s2338_s1 }
   0x2   :  { %2360 = sst [smem:[#allocation28_spill]] %s2340_s3 }
   0x3   :  { %2361 = sst [smem:[#allocation29_spill]] %s2341_s4 }
   0x4   :  { %2362 = sst [smem:[#allocation30_spill]] %s2342_s5 }
   0x5   :  { %12 = vsyncpa [#allocation5], 0 }
   0x6   :  { %14 = vsyncpa [#allocation5 + $0x1], 0 }
   0x7   :  { %15 = vsyncpa [#allocation8], 0 }
   0x8   :  { %17 = vsyncpa [#allocation8 + $0x1], 0 }
   0x9   :  { %18 = vsyncpa [#allocation11], 0 }
   0xa   :  { %19 = vsyncpa [#allocation14], 0 }
   0xb   :  { %20 = vsyncpa [#allocation6], 0 }
   0xc   :  { %22 = vsyncpa [#allocation6 + $0x1], 0  ;;  %s1982_s24 = smov 0   ;;  %s1984_s25 = smov 0  }
   0xd   :  { %s1986_s26 = smov 0   ;;  %s1988_s27 = smov 0  }
   0xe   :  { %s1990_s28 = smov 0   ;;  %s1992_s29 = smov 0  }
   0xf LB: > { %2363 = sst [smem:[#allocation22_spill]] %s1918_s28  ;;  %s2013_s30 = sadd.s32 4294967295, %s1922_s29   ;;  %s1922_s29 = sphi %s1992_s29, %s28_s29   ;;  %s1918_s28 = sphi %s1990_s28, %s2397_s28   ;;  %s1914_s27 = sphi %s1988_s27, %s2396_s27   ;;  %s1910_s26 = sphi %s1986_s26, %s2400_s26   ;;  %s1906_s25 = sphi %s1984_s25, %s2399_s25   ;;  %s1902_s24 = sphi %s1982_s24, %s2398_s24  }
  0x10   : > { %2364 = sst [smem:[#allocation23_spill]] %s1922_s29  ;;  %p1338_p0 = scmp.ge.s32.totalorder %s1922_s29, 1 }
  0x11   : > { %p2352_p1 = scmp.eq.s32.totalorder %s2013_s30, 0  ;;  %p237_p2 = scmp.lt.s32.totalorder %s1922_s29, 3 }
  0x12   : > { %s1924_s9 = smov [#allocation10]   ;;  %s1925_s12 = smov [#allocation13]  }
  0x13   : > { %p2018_p3 = pnand %p1338_p0, %p237_p2  ;;  %s249_s10 = sshll.u32 %s1924_s9, 4  ;;  %s250_s10 = int_to_ptr.vmem [resolvable:$true] %s249_s10 }
  0x14   : > { %s275_s13 = sshll.u32 %s1925_s12, 4  ;;  %s1653_s14 = scalar_lea.vmem %s250_s10, 256  ;;  %s276_s13 = int_to_ptr.vmem [resolvable:$true] %s275_s13 }
  0x15   : > { %p1517_p4 = pneg %p2018_p3  ;;  %p1654_p8 = scmp.ne.s32.totalorder %s250_s10, %s1653_s14 }
  0x16   : > { %p1661_p11 = scmp.lt.s32.totalorder %s250_s10, %s250_s10  ;;  %p1662_p12 = scmp.lt.s32.totalorder %s1653_s14, %s1653_s14 }
  0x17   : > { %p2027_p6 = pnand %p1517_p4, %p2352_p1 }
  0x18   : > { %p1663_p13 = por %p1662_p12, %p1661_p11 }
  0x19   : > { %p2353_p7 = pneg %p2027_p6 }
  0x1b   : > { %p1656_p9 = pnand %p1654_p8, %p2353_p7 }
  0x1d   : > { %p1657_p10 = pneg %p1656_p9 }
  0x1f   : > { %p1664_p0 = pnand %p1663_p13, %p1657_p10 }
  0x21   : > { %1667 = shalt.err (!%p1664_p0)
}
  0x22   : > { %s2345_s15 = smov 64   ;;  %s2347_s16 = smov 4  }
  0x23   : > { %s2367_s3 = sld [smem:[#allocation28_spill]]  ;;  %s1679_s19 = scalar_lea.vmem %s276_s13, 256 }
  0x24   : > { %p1680_p2 = scmp.ne.s32.totalorder %s276_s13, %s1679_s19  ;;  %p1687_p9 = scmp.lt.s32.totalorder %s276_s13, %s276_s13 }
  0x25   : > { %p1688_p10 = scmp.lt.s32.totalorder %s1679_s19, %s1679_s19 }
  0x26   : > { %p1682_p4 = pnand %p1680_p2, %p2353_p7 }
  0x27   : > { %p1689_p11 = por %p1688_p10, %p1687_p9 }
  0x28   : > { %p1683_p8 = pneg %p1682_p4 }
  0x29   : > { %1520 = dma.hbm_to_vmem [thread:$0]  (!%p2027_p6), %s2367_s3, 256, %s250_s10, [#allocation11], %s2345_s15, %s2345_s15, %s2347_s16  }
  0x2a   : > { %p1690_p12 = pnand %p1689_p11, %p1683_p8 }
  0x2c   : > { %1693 = shalt.err (!%p1690_p12)
}
  0x2d   : > { %s2368_s5 = sld [smem:[#allocation30_spill]]  ;;  %s1337_s22 = sadd.s32 4294967294, %s1922_s29  }
  0x2e   : > { %s40_s23 = sadd.s32 1, %s1918_s28  ;;  %s49_s9 = sadd.s32 1, %s1910_s26 }
  0x2f   : > { %p42_p13 = scmp.ge.s32.totalorder %s40_s23, 2  ;;  %p56_p0 = scmp.ne.s32.totalorder %s1910_s26, %s1906_s25 }
  0x30   : > { %p57_p2 = scmp.eq.s32.totalorder %s1922_s29, 0  ;;  %p62_p8 = scmp.ne.s32.totalorder %s1906_s25, %s1902_s24 }
  0x31   : > { %s2402_s23 = smov (%p42_p13, %s40_s23), 0  ;;  %p224_p9 = scmp.eq.s32.totalorder %s2013_s30, 1 }
  0x32   : > { %2369 = sst [smem:[#allocation24_spill]] %s2402_s23  ;;  %p2063_p4 = por %p57_p2, %p56_p0 }
  0x33   : > { %1526 = dma.hbm_to_vmem [thread:$0]  (!%p2027_p6), %s2368_s5, 256, %s276_s13, [#allocation14], %s2345_s15, %s2345_s15, %s2347_s16  }
  0x34   : > { %s44_s12 = ssub.s32 %s1918_s28, %s2402_s23  ;;  %p2074_p11 = por %p2352_p1, %p62_p8 }
  0x35   : > { %p47_p10 = scmp.eq.s32.totalorder %s44_s12, 0  ;;  %p2078_p12 = por %p224_p9, %p56_p0 }
  0x36   : > { %p230_p13 = scmp.eq.s32.totalorder %s1337_s22, 1  ;;  %p1548_p5 = scmp.lt.s32.totalorder %s1922_s29, 2 }
  0x37   : > { %s2372_s14 = scalar_select %p2078_p12, 1, 0 }
  0x38   : > { %s2083_s17 = scalar_select %p47_p10, %s1910_s26, %s49_s9  }
  0x39   : > { %p2085_p2 = por %p230_p13, %p62_p8  ;;  %s2350_s19 = sand.u32 1, %s1910_s26  }
  0x3a   : > { %2373 = sst [smem:[#allocation25_spill]] %s2083_s17  ;;  %s2092_s20 = sshll.u32 %s1918_s28, 6 }
  0x3b   : > { %s2374_s18 = scalar_select %p2085_p2, 1, 0 }
  0x3c   : > { %s2096_s21 = sshll.u32 %s2350_s19, 2  ;;  %p2100_p0 = pnand %p1548_p5, %p2063_p4 }
  0x3d   : > { %2375 = sst [smem:[#allocation26_spill]] %s2374_s18  ;;  %s321_s22 = sand.u32 1, %s1922_s29  }
  0x3e   : > { %s2377_s1 = sld [smem:[#allocation27_spill]]  ;;  %s325_s3 = scalar_lea.vmem [#allocation7], %s2096_s21 }
  0x3f   : > { %s332_s5 = sshll.u32 %s325_s3, 4  ;;  %s2110_s23 = scalar_lea.sflag [#allocation8], %s321_s22  ;;  %s333_s5 = int_to_ptr.vmem [resolvable:$true] %s332_s5 }
  0x40   : > { %p2354_p8 = pneg %p2100_p0  ;;  %s1707_s10 = scalar_lea.vmem %s333_s5, 64 }
  0x41   : > { %p1708_p9 = scmp.ne.s32.totalorder %s333_s5, %s1707_s10  ;;  %s1928_s19 = smov [#allocation7]  }
  0x42   : > { %s1712_s28 = sshll.u32 %s1928_s19, 4  ;;  %s1713_s28 = int_to_ptr.vmem [resolvable:$false] %s1712_s28 }
  0x43   : > { %p1710_p5 = pnand %p1708_p9, %p2354_p8  ;;  %s1714_s17 = scalar_lea.vmem %s1713_s28, 128 }
  0x44   : > { %s330_s16 = scalar_lea.hbm %s2377_s1, %s2092_s20  ;;  %p1715_p10 = scmp.lt.s32.totalorder %s333_s5, %s1713_s28 }
  0x45   : > { %p1711_p4 = pneg %p1710_p5  ;;  %p1716_p13 = scmp.lt.s32.totalorder %s1714_s17, %s1707_s10 }
  0x47   : > { %p1717_p1 = por %p1716_p13, %p1715_p10 }
  0x49   : > { %p1718_p7 = pnand %p1717_p1, %p1711_p4 }
  0x4b   : > { %1721 = shalt.err (!%p1718_p7)
}
  0x4c   : > { %1536 = dma.hbm_to_vmem [thread:$0]  (!%p2100_p0), %s330_s16, 64, %s333_s5, %s2110_s23  }
  0x4d   : > { %s1929_s3 = smov [#allocation12]   ;;  %s1930_s22 = smov [#allocation15]  }
  0x4e   : > { %s262_s15 = sshll.u32 %s1929_s3, 4  ;;  %s288_s9 = sshll.u32 %s1930_s22, 4  ;;  %s263_s15 = int_to_ptr.vmem [resolvable:$true] %s262_s15  ;;  %s289_s9 = int_to_ptr.vmem [resolvable:$true] %s288_s9 }
  0x4f   : > { %s1733_s1 = scalar_lea.vmem %s263_s15, 256  ;;  %p2378_p5 = pneg %p2027_p6 }
  0x50   : > { %p1734_p9 = scmp.ne.s32.totalorder %s263_s15, %s1733_s1  ;;  %p1741_p12 = scmp.lt.s32.totalorder %s263_s15, %s263_s15 }
  0x51   : > { %p1742_p10 = scmp.lt.s32.totalorder %s1733_s1, %s1733_s1 }
  0x52   : > { %p1736_p8 = pnand %p1734_p9, %p2378_p5 }
  0x53   : > { %p1743_p1 = por %p1742_p10, %p1741_p12 }
  0x54   : > { %p1737_p2 = pneg %p1736_p8 }
  0x56   : > { %p1744_p7 = pnand %p1743_p1, %p1737_p2 }
  0x58   : > { %1747 = shalt.err (!%p1744_p7)
}
  0x59   : > { %s2379_s28 = smov 4   ;;  %s2380_s5 = smov 64  }
  0x5a   : > { %s2381_s4 = sld [smem:[#allocation29_spill]]  ;;  %s1759_s19 = scalar_lea.vmem %s289_s9, 256 }
  0x5b   : > { %p1760_p4 = scmp.ne.s32.totalorder %s289_s9, %s1759_s19  ;;  %p2382_p8 = pmov %p2378_p5 }
  0x5c   : > { %p1767_p12 = scmp.lt.s32.totalorder %s289_s9, %s289_s9  ;;  %p1768_p2 = scmp.lt.s32.totalorder %s1759_s19, %s1759_s19 }
  0x5d   : > { %p1762_p13 = pnand %p1760_p4, %p2382_p8 }
  0x5e   : > { %p1769_p5 = por %p1768_p2, %p1767_p12 }
  0x5f   : > { %p1763_p9 = pneg %p1762_p13 }
  0x60   : > { %1523 = dma.hbm_to_vmem [thread:$0]  (!%p2027_p6), %s2381_s4, 256, %s263_s15, [#allocation11], %s2380_s5, %s2380_s5, %s2379_s28  }
  0x61   : > { %p1770_p10 = pnand %p1769_p5, %p1763_p9 }
  0x63   : > { %1773 = shalt.err (!%p1770_p10)
}
  0x64   : > { %1529 = dma.hbm_to_vmem [thread:$0]  (!%p2027_p6), %s2343_s6, 256, %s289_s9, [#allocation14], %s2380_s5, %s2380_s5, %s2379_s28  }
  0x65   : > { %s312_s22 = scalar_lea.hbm %s2337_s0, %s2092_s20  ;;  %s306_s16 = scalar_lea.vmem [#allocation4], %s2096_s21 }
  0x66   : > { %s314_s17 = sshll.u32 %s306_s16, 4  ;;  %s348_s4 = scalar_lea.hbm %s2339_s2, %s2092_s20  ;;  %s315_s17 = int_to_ptr.vmem [resolvable:$true] %s314_s17 }
  0x67   : > { %s2383_s29 = sand.u32 1, %s1910_s26   ;;  %s1787_s1 = scalar_lea.vmem %s315_s17, 64 }
  0x68   : > { %s303_s18 = scalar_lea.sflag [#allocation5], %s2383_s29  ;;  %p1788_p1 = scmp.ne.s32.totalorder %s315_s17, %s1787_s1 }
  0x69   : > { %p2384_p7 = pneg %p2100_p0  ;;  %s1931_s9 = smov [#allocation4]  }
  0x6a   : > { %s1792_s28 = sshll.u32 %s1931_s9, 4  ;;  %s1793_s28 = int_to_ptr.vmem [resolvable:$false] %s1792_s28 }
  0x6b   : > { %p1790_p4 = pnand %p1788_p1, %p2384_p7  ;;  %s1794_s5 = scalar_lea.vmem %s1793_s28, 128 }
  0x6c   : > { %p1795_p6 = scmp.lt.s32.totalorder %s315_s17, %s1793_s28  ;;  %p1796_p13 = scmp.lt.s32.totalorder %s1794_s5, %s1787_s1 }
  0x6d   : > { %p1791_p8 = pneg %p1790_p4 }
  0x6e   : > { %p1797_p9 = por %p1796_p13, %p1795_p6 }
  0x70   : > { %p1798_p12 = pnand %p1797_p9, %p1791_p8 }
  0x72   : > { %1801 = shalt.err (!%p1798_p12)
}
  0x73   : > { %1533 = dma.hbm_to_vmem [thread:$0]  (!%p2100_p0), %s312_s22, 64, %s315_s17, %s303_s18  }
  0x74   : > { %s343_s29 = scalar_lea.vmem [#allocation9], %s2096_s21  ;;  %p2385_p5 = pmov %p2384_p7 }
  0x75   : > { %s350_s10 = sshll.u32 %s343_s29, 4  ;;  %s1932_s15 = smov [#allocation9]   ;;  %s351_s10 = int_to_ptr.vmem [resolvable:$true] %s350_s10 }
  0x76   : > { %s1815_s3 = scalar_lea.vmem %s351_s10, 64  ;;  %s1820_s16 = sshll.u32 %s1932_s15, 4  ;;  %s1821_s16 = int_to_ptr.vmem [resolvable:$false] %s1820_s16 }
  0x77   : > { %p1816_p2 = scmp.ne.s32.totalorder %s351_s10, %s1815_s3  ;;  %s1822_s11 = scalar_lea.vmem %s1821_s16, 128 }
  0x78   : > { %p1823_p7 = scmp.lt.s32.totalorder %s351_s10, %s1821_s16  ;;  %p1824_p4 = scmp.lt.s32.totalorder %s1822_s11, %s1815_s3 }
  0x79   : > { %p1818_p10 = pnand %p1816_p2, %p2385_p5 }
  0x7a   : > { %p1825_p8 = por %p1824_p4, %p1823_p7 }
  0x7b   : > { %p1819_p1 = pneg %p1818_p10 }
  0x7d   : > { %p1826_p6 = pnand %p1825_p8, %p1819_p1 }
  0x7f   : > { %1829 = shalt.err (!%p1826_p6)
}
  0x80   : > { %1539 = dma.hbm_to_vmem [thread:$0]  (!%p2100_p0), %s348_s4, 64, %s351_s10, %s2110_s23  }
  0x81   : > { %359 = sbr.rel (%p2018_p3) target bundleno = 1526 (0x5f6), region = 48  ;;  %s2173_s22 = sand.u32 (!%p2018_p3), 1, %s1906_s25  }
  0x82   : > { %s2176_s17 = sshll.u32 (!%p2018_p3), %s2173_s22, 2  ;;  %s362_s12 = scalar_lea.sflag (!%p2018_p3), [#allocation5], %s2173_s22 }
  0x83   : > { %s365_s19 = scalar_lea.vmem (!%p2018_p3), [#allocation4], %s2176_s17 }
  0x86   : > { %1881 = dma.done.wait (%p2074_p11), %s362_s12, 64  }
  0x87   : > { %1883 = vsyncadd (%p2074_p11), %s362_s12, 4294967232  ;;  %s370_s4 = sand.u32 1, %s2013_s30   ;;  %s374_s23 = scalar_lea.vmem [#allocation7], %s2176_s17 }
  0x88   : > { %s371_s8 = scalar_lea.sflag [#allocation8], %s370_s4 }
  0x89   : > { %1885 = dma.done.wait (%p2074_p11), %s371_s8, 128  }
  0x8a   : > { %1887 = vsyncadd (%p2074_p11), %s371_s8, 4294967168  ;;  %s383_s20 = scalar_lea.vmem [#allocation9], %s2176_s17  ;;  %p2386_p3 = scmp.eq.s32.totalorder %s2013_s30, 0 }
  0x8c   : > { %1889 = dma.done.wait (%p2386_p3), [#allocation11], 512   ;;  %p2387_p0 = pmov %p2386_p3 }
  0x8e   : > { %1891 = vsyncadd (%p2387_p0), [#allocation11], 4294966784  ;;  %p2388_p13 = pmov %p2387_p0 }
  0x8f   : > { %p2389_p9 = pmov %p2387_p0 }
  0x90   : > { %1893 = dma.done.wait (%p2388_p13), [#allocation14], 512  }
  0x91   : > { %1895 = vsyncadd (%p2389_p9), [#allocation14], 4294966784  ;;  %v1933_v0 = vmov 0.0   ;;  %vm1934_vm0 = vmmov 0   ;;  %v1616_v1 = vld [vmem:[#allocation12 + $0x8] sm:$0xff]   ;;  %v1617_v2 = vld [vmem:[#allocation12] sm:$0xff]  }
  0x92   : > { %1413 = vmatprep.subr.bf16.mxu0 %v1933_v0  ;;  %1417 = vmatprep.mubr.msk.bf16.mxu0 %vm1934_vm0, %v1933_v0  ;;  %v445_v3 = vld [vmem:[%s374_s23] sm:$0xf]  ;;  %vm462_vm1 = vcmask 261120   ;;  %v1618_v4 = vld [vmem:[#allocation10 + $0x8] sm:$0xff]   ;;  %v1619_v5 = vld [vmem:[#allocation10] sm:$0xff]   ;;  %vm567_vm2 = vcmask 257024  }
  0x93   : > { %1421 = vmatprep.subr.bf16.mxu1 %v1933_v0  ;;  %1425 = vmatprep.mubr.msk.bf16.mxu1 %vm1934_vm0, %v1933_v0  ;;  %v571_v6 = vld [vmem:[%s365_s19] sm:$0xf]  ;;  %v1621_v8 = vld [vmem:[#allocation13] sm:$0xff]   ;;  %v506_v9 = vld [vmem:[%s383_s20] sm:$0xf]  ;;  %vm636_vm3 = vcmask 64512  }
  0x94   : > { %1414 = vmatpush3.bf16.msra.mxu0 %v1616_v1  ;;  %v1620_v7 = vld [vmem:[#allocation13 + $0x8] sm:$0xff]   ;;  %s1935_s30 = smov 112   ;;  %s1936_s13 = smov 120   ;;  %vm698_vm4 = vcmask 1043456   ;;  %vm1095_vm5 = vcmask 130048   ;;  %vm1098_vm6 = vcmask 195584  }
  0x95   : > { %1415 = vmatprep.subr.bf16.mxu0 %v1933_v0  ;;  %1422 = vmatpush3.bf16.msra.mxu1 %v1620_v7  ;;  %s1937_s1 = smov 104   ;;  %s1938_s9 = smov 8  }
  0x96   : > { %1423 = vmatprep.subr.bf16.mxu1 %v1933_v0  ;;  %s1939_s28 = smov 16   ;;  %s1940_s5 = smov 24  }
  0x97   : > { %s1358_s29 = sshll.u32 %s2173_s22, 3  ;;  %s1382_s10 = sshll.u32 %s1914_s27, 7 }
  0x98   : > { %1416 = vmatpush3.bf16.msra.mxu0 %v1617_v2  ;;  %s439_s3 = scalar_lea.vmem [#allocation16], %s1358_s29  ;;  %s2288_s18 = scalar_lea.hbm %s2344_s7, %s1382_s10 }
  0x99   : > { %1429 = vmatprep.subr.bf16.mxu0 %v1933_v0  ;;  %1424 = vmatpush3.bf16.msra.mxu1 %v1621_v8  ;;  %s1175_s15 = sshll.u32 %s439_s3, 4  ;;  %s1161_s21 = scalar_lea.sflag [#allocation6], %s2173_s22  ;;  %s2290_s15 = int_to_ptr.vmem [resolvable:$true] %s1175_s15 }
  0x9a   : > { %1437 = vmatprep.subr.bf16.mxu1 %v1933_v0  ;;  %s1830_s17 = scalar_lea.vmem %s2290_s15, 128  ;;  %p2390_p12 = scmp.ne.s32.totalorder %s2372_s14, 0 }
  0x9b   : > { %1418 = vmatmul.mubr.msk.bf16.vlgmr.msra.gmra.mxu0 %vm462_vm1, %v445_v3  ;;  %p1831_p11 = scmp.ne.s32.totalorder %s2290_s15, %s1830_s17  ;;  %s1941_s27 = smov [#allocation16]  }
  0x9c   : > { %1430 = vmatpush3.bf16.msra.mxu0 %v1618_v4  ;;  %1433 = vmatprep.mubr.msk.bf16.mxu0 %vm1934_vm0, %v1933_v0  ;;  %s1834_s12 = sshll.u32 %s1941_s27, 4  ;;  %s1835_s12 = int_to_ptr.vmem [resolvable:$false] %s1834_s12 }
  0x9d   : > { %1431 = vmatprep.subr.bf16.mxu0 %v1933_v0  ;;  %1426 = vmatmul.mubr.msk.bf16.vlgmr.msra.gmra.mxu1 %vm462_vm1, %v506_v9  ;;  %p1832_p2 = pnand %p1831_p11, %p2390_p12  ;;  %s1836_s19 = scalar_lea.vmem %s1835_s12, 256 }
  0x9e   : > { %1439 = vmatprep.mubr.msk.bf16.mxu1 %vm1934_vm0, %v1933_v0  ;;  %p1837_p10 = scmp.lt.s32.totalorder %s2290_s15, %s1835_s12  ;;  %p1838_p1 = scmp.lt.s32.totalorder %s1836_s19, %s1830_s17 }
  0x9f   : > { %p1833_p5 = pneg %p1832_p2 }
  0xa0   : > { %1432 = vmatpush3.bf16.msra.mxu0 %v1619_v5  ;;  %p1839_p7 = por %p1838_p1, %p1837_p10 }
  0xa1   : > { %1443 = vmatprep.subr.bf16.mxu0 %v1933_v0 }
  0xa2   : > { %p1840_p4 = pnand %p1839_p7, %p1833_p5 }
  0xa3   : > { %1434 = vmatmul.mubr.msk.bf16.vlgmr.msra.gmra.mxu0 %vm462_vm1, %v571_v6 }
  0xa4   : > { %1445 = vmatprep.mubr.msk.bf16.mxu0 %vm1934_vm0, %v1933_v0 }
 0x15b   : > { %v500_v10 = vpop.f32.mrf.mxu0 }
 0x15c   : > { %v566_v11 = vpack.c.bf16 %v500_v10, %v500_v10 }
 0x15d   : > { %v1419_v12 = vpop.f32.mrf.mxu0  ;;  %v560_v24 = vpop.f32.mrf.mxu1 }
 0x15e   : > { %568 = vst.msk [vmem:[#allocation2] sm:$0xf] %vm567_vm2, %v566_v11  ;;  %v569_v25 = vpack.c.bf16 %v560_v24, %v560_v24 }
 0x15f   : > { %v503_v13 = vpop.f32.mrf.mxu0  ;;  %v1427_v26 = vpop.f32.mrf.mxu1 }
 0x160   : > { %570 = vst.msk [vmem:[#allocation3] sm:$0xf] %vm567_vm2, %v569_v25 }
 0x161   : > { %v1420_v14 = vpop.f32.mrf.mxu0  ;;  %v563_v27 = vpop.f32.mrf.mxu1 }
 0x163   : > { %v626_v15 = vpop.f32.mrf.mxu0  ;;  %v1428_v28 = vpop.f32.mrf.mxu1 }
 0x164   : > { %v632_v16 = vmul.f32 0.35355338, %v626_v15 }
 0x165   : > { %v1435_v17 = vpop.f32.mrf.mxu0  ;;  %v634_v18 = vld [vmem:[#allocation2] sm:$0xf] }
 0x166   : > { %v641_v19 = vsel %vm636_vm3, %v634_v18, 0  ;;  %v1370_v20 = vcombine.low %v634_v18, %v634_v18  ;;  %v633_v22 = vpack.c.bf16 %v632_v16, %v632_v16 }
 0x167   : > { %1438 = vmatpush3.bf16.xpose.msra.mxu1 %v641_v19  ;;  %v629_v21 = vpop.f32.mrf.mxu0  ;;  %v635_v29 = vld [vmem:[#allocation3] sm:$0xf] }
 0x168   : > { %863 = vrot.lane.b32.xlu1 %v1370_v20, %s1935_s30  ;;  %749 = vrot.lane.b32.xlu0 %v1370_v20, %s1936_s13  ;;  %v700_v30 = vsel %vm698_vm4, %v635_v29, 0  ;;  %v1372_v2 = vcombine.low %v635_v29, %v635_v29 }
 0x169   : > { %v1436_v23 = vpop.f32.mrf.mxu0  ;;  %1449 = vmatprep.subr.bf16.mxu1 %v1933_v0  ;;  %1444 = vmatpush3.bf16.msra.mxu0 %v700_v30 }
 0x16a   : > { %1455 = vmatprep.subr.bf16.mxu0 %v1933_v0 }
 0x16c   : > { %861 = vrot.lane.b32.xlu1 %v633_v22, %s1935_s30  ;;  %744 = vrot.lane.b32.xlu0 %v633_v22, %s1936_s13 }
 0x16e   : > { %1440 = vmatmul.mubr.msk.bf16.vlgmr.msra.gmra.mxu1 %vm636_vm3, %v633_v22 }
 0x16f   : > { %1451 = vmatprep.mubr.msk.bf16.mxu1 %vm1934_vm0, %v1933_v0 }
 0x170   : > { %972 = vrot.lane.b32.xlu1 %v633_v22, %s1937_s1  ;;  %974 = vrot.lane.b32.xlu0 %v1370_v20, %s1937_s1 }
 0x1da   : > { %v750_v31 = vpop.permute.xlu0 %749  ;;  %v864_v33 = vpop.permute.xlu1 %863 }
 0x1db   : > { %v755_v32 = vsel %vm636_vm3, %v750_v31, 0  ;;  %v869_v35 = vsel %vm636_vm3, %v864_v33, 0 }
 0x1dc   : > { %1450 = vmatpush3.bf16.xpose.msra.mxu1 %v755_v32 }
 0x1dd   : > { %1461 = vmatprep.subr.bf16.mxu1 %v1933_v0 }
 0x1de   : > { %v745_v34 = vpop.permute.xlu0 %744  ;;  %v862_v37 = vpop.permute.xlu1 %861 }
 0x1e2   : > { %v975_v36 = vpop.permute.xlu0 %974  ;;  %v973_v39 = vpop.permute.xlu1 %972 }
 0x1e3   : > { %1452 = vmatmul.mubr.msk.bf16.vlgmr.msra.gmra.mxu1 %vm636_vm3, %v745_v34  ;;  %v980_v38 = vsel %vm636_vm3, %v975_v36, 0 }
 0x1e4   : > { %1462 = vmatpush3.bf16.xpose.msra.mxu1 %v869_v35  ;;  %1463 = vmatprep.mubr.msk.bf16.mxu1 %vm1934_vm0, %v1933_v0 }
 0x1e5   : > { %1473 = vmatprep.subr.bf16.mxu1 %v1933_v0 }
 0x1eb   : > { %1464 = vmatmul.mubr.msk.bf16.vlgmr.msra.gmra.mxu1 %vm636_vm3, %v862_v37 }
 0x1ec   : > { %1474 = vmatpush3.bf16.xpose.msra.mxu1 %v980_v38  ;;  %1475 = vmatprep.mubr.msk.bf16.mxu1 %vm1934_vm0, %v1933_v0 }
 0x1ed   : > { %1485 = vmatprep.subr.bf16.mxu1 %v1933_v0 }
 0x1f3   : > { %1476 = vmatmul.mubr.msk.bf16.vlgmr.msra.gmra.mxu1 %vm636_vm3, %v973_v39 }
 0x1f4   : > { %1489 = vmatprep.mubr.msk.bf16.mxu1 %vm1934_vm0, %v1933_v0 }
 0x22e   : > { %v677_v40 = vpop.f32.mrf.mxu1 }
 0x22f   : > { %v683_v41 = vsel %vm636_vm3, %v677_v40, -inf }
 0x230   : > { %684 = vmax.xlane.f32.xlu0 %v683_v41  ;;  %v1441_v42 = vpop.f32.mrf.mxu1 }
 0x232   : > { %v680_v43 = vpop.f32.mrf.mxu1 }
 0x234   : > { %v1442_v44 = vpop.f32.mrf.mxu1 }
 0x235   : > { %v1624_v44 = vld [vmem:[#allocation15 + $0x8] sm:$0xff]  }
 0x236   : > { %1486 = vmatpush3.bf16.msra.mxu1 %v1624_v44 }
 0x237   : > { %1487 = vmatprep.subr.bf16.mxu1 %v1933_v0 }
 0x2a3   : > { %v791_v45 = vpop.f32.mrf.mxu1 }
 0x2a4   : > { %v797_v46 = vsel %vm636_vm3, %v791_v45, -inf }
 0x2a5   : > { %798 = vmax.xlane.f32.xlu1 %v797_v46  ;;  %v1453_v47 = vpop.f32.mrf.mxu1  ;;  %v1625_v46 = vld [vmem:[#allocation15] sm:$0xff]  }
 0x2a6   : > { %1488 = vmatpush3.bf16.msra.mxu1 %v1625_v46 }
 0x2a7   : > { %v794_v48 = vpop.f32.mrf.mxu1 }
 0x2a9   : > { %v1454_v49 = vpop.f32.mrf.mxu1 }
 0x2ab   : > { %v905_v50 = vpop.f32.mrf.mxu1 }
 0x2ac   : > { %v911_v51 = vsel %vm636_vm3, %v905_v50, -inf }
 0x2ad   : > { %912 = vmax.xlane.f32.xlu0 %v911_v51  ;;  %v1465_v52 = vpop.f32.mrf.mxu1 }
 0x2af   : > { %v908_v53 = vpop.f32.mrf.mxu1 }
 0x2b1   : > { %v1466_v54 = vpop.f32.mrf.mxu1 }
 0x2b3   : > { %v1016_v55 = vpop.f32.mrf.mxu1 }
 0x2b4   : > { %v1022_v56 = vsel %vm636_vm3, %v1016_v55, -inf }
 0x2b5   : > { %1023 = vmax.xlane.f32.xlu0 %v1022_v56  ;;  %v1477_v57 = vpop.f32.mrf.mxu1 }
 0x2b7   : > { %v1019_v58 = vpop.f32.mrf.mxu1 }
 0x2b9   : > { %v685_v59 = vpop.xlane.xlu0 %684  ;;  %v1478_v60 = vpop.f32.mrf.mxu1 }
 0x2ba   : > { %v686_v61 = vsub.f32 %v677_v40, %v685_v59 }
 0x2bc   : > { %v687_v62 = vmul.f32 1.442695, %v686_v61 }
 0x2be   : > { %1626 = vpow2.f32 %v687_v62 }
 0x2cb   : > { %v1627_v63 = vpop.eup %1626 }
 0x2cc   : > { %v689_v1 = vsel %vm636_vm3, %v1627_v63, 0.0 }
 0x2cd   : > { %690 = vadd.xlane.f32.xlu1 %v689_v1 }
 0x2de   : > { %812 = vrot.lane.b32.xlu1 %v1372_v2, %s1936_s13 }
 0x32e   : > { %v799_v3 = vpop.xlane.xlu1 %798 }
 0x32f   : > { %v800_v4 = vsub.f32 %v791_v45, %v799_v3 }
 0x331   : > { %v801_v5 = vmul.f32 1.442695, %v800_v4 }
 0x333   : > { %1628 = vpow2.f32 %v801_v5 }
 0x336   : > { %v913_v6 = vpop.xlane.xlu0 %912 }
 0x337   : > { %v914_v7 = vsub.f32 %v905_v50, %v913_v6 }
 0x339   : > { %v915_v8 = vmul.f32 1.442695, %v914_v7 }
 0x33b   : > { %1630 = vpow2.f32 %v915_v8 }
 0x33e   : > { %v1024_v9 = vpop.xlane.xlu0 %1023 }
 0x33f   : > { %v1025_v10 = vsub.f32 %v1016_v55, %v1024_v9 }
 0x340   : > { %v1629_v11 = vpop.eup %1628 }
 0x341   : > { %v1026_v12 = vmul.f32 1.442695, %v1025_v10  ;;  %v803_v13 = vsel %vm636_vm3, %v1629_v11, 0.0 }
 0x342   : > { %804 = vadd.xlane.f32.xlu0 %v803_v13 }
 0x343   : > { %1632 = vpow2.f32 %v1026_v12 }
 0x348   : > { %v1631_v14 = vpop.eup %1630 }
 0x349   : > { %v917_v15 = vsel %vm636_vm3, %v1631_v14, 0.0 }
 0x34a   : > { %918 = vadd.xlane.f32.xlu1 %v917_v15 }
 0x350   : > { %v1633_v16 = vpop.eup %1632 }
 0x351   : > { %v1028_v17 = vsel %vm636_vm3, %v1633_v16, 0.0 }
 0x352   : > { %1029 = vadd.xlane.f32.xlu0 %v1028_v17 }
 0x356   : > { %v691_v18 = vpop.xlane.xlu1 %690 }
 0x357   : > { %1634 = vrcp.f32 %v691_v18 }
 0x35a   : > { %v813_v21 = vpop.permute.xlu1 %812 }
 0x35b   : > { %1034 = vrot.lane.b32.xlu1 %v1372_v2, %s1937_s1  ;;  %v818_v23 = vsel %vm698_vm4, %v813_v21, 0 }
 0x364   : > { %v1635_v19 = vpop.eup %1634 }
 0x365   : > { %v693_v20 = vmul.f32 %v1635_v19, %v1627_v63 }
 0x367   : > { %v694_v22 = vpack.c.bf16 %v693_v20, %v693_v20 }
 0x368   : > { %923 = vrot.lane.b32.xlu0 %v1372_v2, %s1935_s30 }
 0x369   : > { %1446 = vmatmul.mubr.msk.bf16.vlgmr.msra.gmra.mxu0 %vm636_vm3, %v694_v22 }
 0x36a   : > { %1456 = vmatpush3.bf16.msra.mxu0 %v818_v23  ;;  %1457 = vmatprep.mubr.msk.bf16.mxu0 %vm1934_vm0, %v1933_v0 }
 0x36b   : > { %1467 = vmatprep.subr.bf16.mxu0 %v1933_v0 }
 0x3cb   : > { %v805_v24 = vpop.xlane.xlu0 %804 }
 0x3cc   : > { %1636 = vrcp.f32 %v805_v24 }
 0x3d3   : > { %v919_v25 = vpop.xlane.xlu1 %918 }
 0x3d4   : > { %1638 = vrcp.f32 %v919_v25 }
 0x3d7   : > { %v1035_v34 = vpop.permute.xlu1 %1034 }
 0x3d8   : > { %v1040_v36 = vsel %vm698_vm4, %v1035_v34, 0 }
 0x3d9   : > { %v1637_v26 = vpop.eup %1636 }
 0x3da   : > { %v807_v27 = vmul.f32 %v1637_v26, %v1629_v11 }
 0x3db   : > { %v1030_v28 = vpop.xlane.xlu0 %1029 }
 0x3dc   : > { %1640 = vrcp.f32 %v1030_v28  ;;  %v808_v29 = vpack.c.bf16 %v807_v27, %v807_v27 }
 0x3de   : > { %1458 = vmatmul.mubr.msk.bf16.vlgmr.msra.gmra.mxu0 %vm636_vm3, %v808_v29 }
 0x3df   : > { %v924_v30 = vpop.permute.xlu0 %923  ;;  %1469 = vmatprep.mubr.msk.bf16.mxu0 %vm1934_vm0, %v1933_v0 }
 0x3e0   : > { %v929_v31 = vsel %vm698_vm4, %v924_v30, 0 }
 0x3e1   : > { %v1639_v32 = vpop.eup %1638  ;;  %1468 = vmatpush3.bf16.msra.mxu0 %v929_v31 }
 0x3e2   : > { %1479 = vmatprep.subr.bf16.mxu0 %v1933_v0  ;;  %v921_v33 = vmul.f32 %v1639_v32, %v1631_v14 }
 0x3e4   : > { %v922_v35 = vpack.c.bf16 %v921_v33, %v921_v33 }
 0x3e6   : > { %1470 = vmatmul.mubr.msk.bf16.vlgmr.msra.gmra.mxu0 %vm636_vm3, %v922_v35 }
 0x3e7   : > { %1480 = vmatpush3.bf16.msra.mxu0 %v1040_v36  ;;  %1481 = vmatprep.mubr.msk.bf16.mxu0 %vm1934_vm0, %v1933_v0 }
 0x3e9   : > { %v1641_v37 = vpop.eup %1640 }
 0x3ea   : > { %v1032_v38 = vmul.f32 %v1641_v37, %v1633_v16 }
 0x3ec   : > { %v1033_v39 = vpack.c.bf16 %v1032_v38, %v1032_v38 }
 0x3ee   : > { %1482 = vmatmul.mubr.msk.bf16.vlgmr.msra.gmra.mxu0 %vm636_vm3, %v1033_v39 }
 0x429   : > { %v736_v40 = vpop.f32.mrf.mxu0 }
 0x42a   : > { %v742_v61 = vpack.c.bf16 %v736_v40, %v736_v40 }
 0x42b   : > { %v1447_v41 = vpop.f32.mrf.mxu0 }
 0x42d   : > { %v739_v42 = vpop.f32.mrf.mxu0 }
 0x42f   : > { %v1448_v43 = vpop.f32.mrf.mxu0 }
 0x49e   : > { %v854_v45 = vpop.f32.mrf.mxu0 }
 0x49f   : > { %v860_v47 = vpack.c.bf16 %v854_v45, %v854_v45 }
 0x4a0   : > { %v1459_v48 = vpop.f32.mrf.mxu0 }
 0x4a1   : > { %1084 = vrot.lane.b32.xlu1 %v860_v47, %s1938_s9 }
 0x4a2   : > { %v857_v49 = vpop.f32.mrf.mxu0 }
 0x4a4   : > { %v1460_v50 = vpop.f32.mrf.mxu0 }
 0x4a6   : > { %v965_v51 = vpop.f32.mrf.mxu0 }
 0x4a7   : > { %v971_v52 = vpack.c.bf16 %v965_v51, %v965_v51 }
 0x4a8   : > { %v1471_v53 = vpop.f32.mrf.mxu0 }
 0x4a9   : > { %1087 = vrot.lane.b32.xlu0 %v971_v52, %s1939_s28 }
 0x4aa   : > { %v968_v54 = vpop.f32.mrf.mxu0 }
 0x4ac   : > { %v1472_v55 = vpop.f32.mrf.mxu0 }
 0x4ae   : > { %v1076_v56 = vpop.f32.mrf.mxu0 }
 0x4af   : > { %v1082_v57 = vpack.c.bf16 %v1076_v56, %v1076_v56 }
 0x4b0   : > { %v1483_v58 = vpop.f32.mrf.mxu0 }
 0x4b1   : > { %1090 = vrot.lane.b32.xlu1 %v1082_v57, %s1940_s5 }
 0x4b2   : > { %v1079_v0 = vpop.f32.mrf.mxu0 }
 0x4b4   : > { %v1484_v59 = vpop.f32.mrf.mxu0 }
 0x513   : > { %v1085_v60 = vpop.permute.xlu1 %1084 }
 0x514   : > { %v1094_v63 = vsel %vm636_vm3, %v742_v61, %v1085_v60 }
 0x51b   : > { %v1088_v62 = vpop.permute.xlu0 %1087 }
 0x51c   : > { %v1097_v1 = vsel %vm1095_vm5, %v1094_v63, %v1088_v62 }
 0x523   : > { %v1091_v2 = vpop.permute.xlu1 %1090 }
 0x524   : > { %v1100_v3 = vsel %vm1098_vm6, %v1097_v1, %v1091_v2 }
 0x525   : > { %1490 = vmatmul.mubr.msk.bf16.vlgmr.msra.gmra.mxu1 %vm462_vm1, %v1100_v3 }
 0x5e5   : > { %v1153_v4 = vpop.f32.mrf.mxu1 }
 0x5e6   : > { %1159 = vst.msk [vmem:[%s439_s3] sm:$0xff] %vm462_vm1, %v1153_v4 }
 0x5e7   : > { %v1491_v5 = vpop.f32.mrf.mxu1 }
 0x5e8   : > { %1843 = shalt.err (!%p1840_p4)
}
 0x5e9   : > { %s1844_s4 = scalar_lea.hbm %s2288_s18, 128  ;;  %s1848_s23 = scalar_lea.hbm %s2344_s7, 256 }
 0x5ea   : > { %p1845_p8 = scmp.ne.s32.totalorder %s2288_s18, %s1844_s4  ;;  %p1849_p0 = scmp.lt.s32.totalorder %s2288_s18, %s2344_s7 }
 0x5eb   : > { %p1850_p13 = scmp.lt.s32.totalorder %s1848_s23, %s1844_s4 }
 0x5ec   : > { %p1846_p6 = pnand %p1845_p8, %p2390_p12 }
 0x5ed   : > { %p1851_p9 = por %p1850_p13, %p1849_p0 }
 0x5ee   : > { %p1847_p3 = pneg %p1846_p6 }
 0x5f0   : > { %p1852_p11 = pnand %p1851_p9, %p1847_p3 }
 0x5f2   : > { %1855 = shalt.err (!%p1852_p11)
}
 0x5f3   : > { %1515 = dma.vmem_to_hbm [thread:$0]  (%p2390_p12), %s2290_s15, 128, %s2288_s18, %s1161_s21   ;;  %v1156_v6 = vpop.f32.mrf.mxu1 }
 0x5f5   : > { %v1492_v7 = vpop.f32.mrf.mxu1 }
 0x5f6 PF: > { %s2391_s13 = sld [smem:[#allocation26_spill]]  ;;  %s1187_s9 = sand.u32 1, %s1902_s24  }
 0x5f7   : > { %s2392_s1 = sld [smem:[#allocation23_spill]]  ;;  %s1188_s28 = scalar_lea.sflag [#allocation6], %s1187_s9 }
 0x5fc   : > { %p2393_p2 = scmp.ne.s32.totalorder %s2391_s13, 0 }
 0x5fd   : > { %p2394_p5 = scmp.ge.s32.totalorder %s2392_s1, 2 }
 0x5ff   : > { %p1541_p10 = pnand %p2394_p5, %p2393_p2 }
 0x601   : > { %p1542_p1 = pneg %p1541_p10 }
 0x603   : > { %1897 = dma.done.wait (%p1542_p1), %s1188_s28, 128  }
 0x604   : > { %1899 = vsyncadd (%p1542_p1), %s1188_s28, 4294967168  ;;  %s28_s29 = sadd.s32 1, %s2392_s1   ;;  %s2395_s14 = sld [smem:[#allocation25_spill]] }
 0x605   : > { %p25_p7 = scmp.ge.s32.totalorder %s28_s29, 4   ;;  %s2396_s27 = sld [smem:[#allocation22_spill]] }
 0x606   : > { %s2397_s28 = sld [smem:[#allocation24_spill]]  ;;  %s2398_s24 = smov %s1906_s25 }
 0x607   : > { %s2399_s25 = smov %s1910_s26  ;;  %27 = sbr.rel (!%p25_p7) target bundleno = 15 (0xf), region = 137 }
 0x60a   : > { %s2400_s26 = smov %s2395_s14 }
 0x60c   :  { %1193 = vsyncpa [#allocation5], 1 }
 0x60d   :  { %1195 = vsyncpa [#allocation5 + $0x1], 1 }
 0x60e   :  { %1196 = vsyncpa [#allocation8], 1 }
 0x60f   :  { %1198 = vsyncpa [#allocation8 + $0x1], 1 }
 0x610   :  { %1199 = vsyncpa [#allocation11], 1 }
 0x611   :  { %1200 = vsyncpa [#allocation14], 1 }
 0x612   :  { %1201 = vsyncpa [#allocation6], 1 }
 0x613   :  { %1203 = vsyncpa [#allocation6 + $0x1], 1 }

// kernel: tpu_custom_call.1
= control target key start
LH: loop header
LB: loop body
LE: loop exit
PB: predicated region body
PF: predicated region fallthrough
CT: control target
= control target key end

     0   :  { %s2337_s0 = inlined_call_operand.hbm [shape: bf16[2,8,32], index: 0, kind: input, shape index: {}]   ;;  %s2338_s1 = inlined_call_operand.hbm [shape: bf16[2,8,32], index: 1, kind: input, shape index: {}]   ;;  %s2339_s2 = inlined_call_operand.hbm [shape: bf16[2,8,32], index: 2, kind: input, shape index: {}]   ;;  %s2340_s3 = inlined_call_operand.hbm [shape: bf16[32,32], index: 3, kind: input, shape index: {}]   ;;  %s2341_s4 = inlined_call_operand.hbm [shape: bf16[32,32], index: 4, kind: input, shape index: {}]   ;;  %s2342_s5 = inlined_call_operand.hbm [shape: bf16[32,32], index: 5, kind: input, shape index: {}]   ;;  %s2343_s6 = inlined_call_operand.hbm [shape: bf16[32,32], index: 6, kind: input, shape index: {}]   ;;  %s2344_s7 = inlined_call_operand.hbm [shape: f32[2,8,32], index: 7, kind: output, shape index: {}]  }
   0x1   :  { %2359 = sst [smem:[#allocation27_spill]] %s2338_s1 }
   0x2   :  { %2360 = sst [smem:[#allocation28_spill]] %s2340_s3 }
   0x3   :  { %2361 = sst [smem:[#allocation29_spill]] %s2341_s4 }
   0x4   :  { %2362 = sst [smem:[#allocation30_spill]] %s2342_s5 }
   0x5   :  { %12 = vsyncpa [#allocation5], 0 }
   0x6   :  { %14 = vsyncpa [#allocation5 + $0x1], 0 }
   0x7   :  { %15 = vsyncpa [#allocation8], 0 }
   0x8   :  { %17 = vsyncpa [#allocation8 + $0x1], 0 }
   0x9   :  { %18 = vsyncpa [#allocation11], 0 }
   0xa   :  { %19 = vsyncpa [#allocation14], 0 }
   0xb   :  { %20 = vsyncpa [#allocation6], 0 }
   0xc   :  { %22 = vsyncpa [#allocation6 + $0x1], 0  ;;  %s1982_s24 = smov 0   ;;  %s1984_s25 = smov 0  }
   0xd   :  { %s1986_s26 = smov 0   ;;  %s1988_s27 = smov 0  }
   0xe   :  { %s1990_s28 = smov 0   ;;  %s1992_s29 = smov 0  }
   0xf LB: > { %2363 = sst [smem:[#allocation22_spill]] %s1918_s28  ;;  %s2013_s30 = sadd.s32 4294967295, %s1922_s29   ;;  %s1922_s29 = sphi %s1992_s29, %s28_s29   ;;  %s1918_s28 = sphi %s1990_s28, %s2397_s28   ;;  %s1914_s27 = sphi %s1988_s27, %s2396_s27   ;;  %s1910_s26 = sphi %s1986_s26, %s2400_s26   ;;  %s1906_s25 = sphi %s1984_s25, %s2399_s25   ;;  %s1902_s24 = sphi %s1982_s24, %s2398_s24  }
  0x10   : > { %2364 = sst [smem:[#allocation23_spill]] %s1922_s29  ;;  %p1338_p0 = scmp.ge.s32.totalorder %s1922_s29, 1 }
  0x11   : > { %p2352_p1 = scmp.eq.s32.totalorder %s2013_s30, 0  ;;  %p237_p2 = scmp.lt.s32.totalorder %s1922_s29, 3 }
  0x12   : > { %s1924_s9 = smov [#allocation10]   ;;  %s1925_s12 = smov [#allocation13]  }
  0x13   : > { %p2018_p3 = pnand %p1338_p0, %p237_p2  ;;  %s249_s10 = sshll.u32 %s1924_s9, 4  ;;  %s250_s10 = int_to_ptr.vmem [resolvable:$true] %s249_s10 }
  0x14   : > { %s275_s13 = sshll.u32 %s1925_s12, 4  ;;  %s1653_s14 = scalar_lea.vmem %s250_s10, 256  ;;  %s276_s13 = int_to_ptr.vmem [resolvable:$true] %s275_s13 }
  0x15   : > { %p1517_p4 = pneg %p2018_p3  ;;  %p1654_p8 = scmp.ne.s32.totalorder %s250_s10, %s1653_s14 }
  0x16   : > { %p1661_p11 = scmp.lt.s32.totalorder %s250_s10, %s250_s10  ;;  %p1662_p12 = scmp.lt.s32.totalorder %s1653_s14, %s1653_s14 }
  0x17   : > { %p2027_p6 = pnand %p1517_p4, %p2352_p1 }
  0x18   : > { %p1663_p13 = por %p1662_p12, %p1661_p11 }
  0x19   : > { %p2353_p7 = pneg %p2027_p6 }
  0x1b   : > { %p1656_p9 = pnand %p1654_p8, %p2353_p7 }
  0x1d   : > { %p1657_p10 = pneg %p1656_p9 }
  0x1f   : > { %p1664_p0 = pnand %p1663_p13, %p1657_p10 }
  0x21   : > { %1667 = shalt.err (!%p1664_p0)
}
  0x22   : > { %s2345_s15 = smov 64   ;;  %s2347_s16 = smov 4  }
  0x23   : > { %s2367_s3 = sld [smem:[#allocation28_spill]]  ;;  %s1679_s19 = scalar_lea.vmem %s276_s13, 256 }
  0x24   : > { %p1680_p2 = scmp.ne.s32.totalorder %s276_s13, %s1679_s19  ;;  %p1687_p9 = scmp.lt.s32.totalorder %s276_s13, %s276_s13 }
  0x25   : > { %p1688_p10 = scmp.lt.s32.totalorder %s1679_s19, %s1679_s19 }
  0x26   : > { %p1682_p4 = pnand %p1680_p2, %p2353_p7 }
  0x27   : > { %p1689_p11 = por %p1688_p10, %p1687_p9 }
  0x28   : > { %p1683_p8 = pneg %p1682_p4 }
  0x29   : > { %1520 = dma.hbm_to_vmem [thread:$0]  (!%p2027_p6), %s2367_s3, 256, %s250_s10, [#allocation11], %s2345_s15, %s2345_s15, %s2347_s16  }
  0x2a   : > { %p1690_p12 = pnand %p1689_p11, %p1683_p8 }
  0x2c   : > { %1693 = shalt.err (!%p1690_p12)
}
  0x2d   : > { %s2368_s5 = sld [smem:[#allocation30_spill]]  ;;  %s1337_s22 = sadd.s32 4294967294, %s1922_s29  }
  0x2e   : > { %s40_s23 = sadd.s32 1, %s1918_s28  ;;  %s49_s9 = sadd.s32 1, %s1910_s26 }
  0x2f   : > { %p42_p13 = scmp.ge.s32.totalorder %s40_s23, 2  ;;  %p56_p0 = scmp.ne.s32.totalorder %s1910_s26, %s1906_s25 }
  0x30   : > { %p57_p2 = scmp.eq.s32.totalorder %s1922_s29, 0  ;;  %p62_p8 = scmp.ne.s32.totalorder %s1906_s25, %s1902_s24 }
  0x31   : > { %s2402_s23 = smov (%p42_p13, %s40_s23), 0  ;;  %p224_p9 = scmp.eq.s32.totalorder %s2013_s30, 1 }
  0x32   : > { %2369 = sst [smem:[#allocation24_spill]] %s2402_s23  ;;  %p2063_p4 = por %p57_p2, %p56_p0 }
  0x33   : > { %1526 = dma.hbm_to_vmem [thread:$0]  (!%p2027_p6), %s2368_s5, 256, %s276_s13, [#allocation14], %s2345_s15, %s2345_s15, %s2347_s16  }
  0x34   : > { %s44_s12 = ssub.s32 %s1918_s28, %s2402_s23  ;;  %p2074_p11 = por %p2352_p1, %p62_p8 }
  0x35   : > { %p47_p10 = scmp.eq.s32.totalorder %s44_s12, 0  ;;  %p2078_p12 = por %p224_p9, %p56_p0 }
  0x36   : > { %p230_p13 = scmp.eq.s32.totalorder %s1337_s22, 1  ;;  %p1548_p5 = scmp.lt.s32.totalorder %s1922_s29, 2 }
  0x37   : > { %s2372_s14 = scalar_select %p2078_p12, 1, 0 }
  0x38   : > { %s2083_s17 = scalar_select %p47_p10, %s1910_s26, %s49_s9  }
  0x39   : > { %p2085_p2 = por %p230_p13, %p62_p8  ;;  %s2350_s19 = sand.u32 1, %s1910_s26  }
  0x3a   : > { %2373 = sst [smem:[#allocation25_spill]] %s2083_s17  ;;  %s2092_s20 = sshll.u32 %s1918_s28, 6 }
  0x3b   : > { %s2374_s18 = scalar_select %p2085_p2, 1, 0 }
  0x3c   : > { %s2096_s21 = sshll.u32 %s2350_s19, 2  ;;  %p2100_p0 = pnand %p1548_p5, %p2063_p4 }
  0x3d   : > { %2375 = sst [smem:[#allocation26_spill]] %s2374_s18  ;;  %s321_s22 = sand.u32 1, %s1922_s29  }
  0x3e   : > { %s2377_s1 = sld [smem:[#allocation27_spill]]  ;;  %s325_s3 = scalar_lea.vmem [#allocation7], %s2096_s21 }
  0x3f   : > { %s332_s5 = sshll.u32 %s325_s3, 4  ;;  %s2110_s23 = scalar_lea.sflag [#allocation8], %s321_s22  ;;  %s333_s5 = int_to_ptr.vmem [resolvable:$true] %s332_s5 }
  0x40   : > { %p2354_p8 = pneg %p2100_p0  ;;  %s1707_s10 = scalar_lea.vmem %s333_s5, 64 }
  0x41   : > { %p1708_p9 = scmp.ne.s32.totalorder %s333_s5, %s1707_s10  ;;  %s1928_s19 = smov [#allocation7]  }
  0x42   : > { %s1712_s28 = sshll.u32 %s1928_s19, 4  ;;  %s1713_s28 = int_to_ptr.vmem [resolvable:$false] %s1712_s28 }
  0x43   : > { %p1710_p5 = pnand %p1708_p9, %p2354_p8  ;;  %s1714_s17 = scalar_lea.vmem %s1713_s28, 128 }
  0x44   : > { %s330_s16 = scalar_lea.hbm %s2377_s1, %s2092_s20  ;;  %p1715_p10 = scmp.lt.s32.totalorder %s333_s5, %s1713_s28 }
  0x45   : > { %p1711_p4 = pneg %p1710_p5  ;;  %p1716_p13 = scmp.lt.s32.totalorder %s1714_s17, %s1707_s10 }
  0x47   : > { %p1717_p1 = por %p1716_p13, %p1715_p10 }
  0x49   : > { %p1718_p7 = pnand %p1717_p1, %p1711_p4 }
  0x4b   : > { %1721 = shalt.err (!%p1718_p7)
}
  0x4c   : > { %1536 = dma.hbm_to_vmem [thread:$0]  (!%p2100_p0), %s330_s16, 64, %s333_s5, %s2110_s23  }
  0x4d   : > { %s1929_s3 = smov [#allocation12]   ;;  %s1930_s22 = smov [#allocation15]  }
  0x4e   : > { %s262_s15 = sshll.u32 %s1929_s3, 4  ;;  %s288_s9 = sshll.u32 %s1930_s22, 4  ;;  %s263_s15 = int_to_ptr.vmem [resolvable:$true] %s262_s15  ;;  %s289_s9 = int_to_ptr.vmem [resolvable:$true] %s288_s9 }
  0x4f   : > { %s1733_s1 = scalar_lea.vmem %s263_s15, 256  ;;  %p2378_p5 = pneg %p2027_p6 }
  0x50   : > { %p1734_p9 = scmp.ne.s32.totalorder %s263_s15, %s1733_s1  ;;  %p1741_p12 = scmp.lt.s32.totalorder %s263_s15, %s263_s15 }
  0x51   : > { %p1742_p10 = scmp.lt.s32.totalorder %s1733_s1, %s1733_s1 }
  0x52   : > { %p1736_p8 = pnand %p1734_p9, %p2378_p5 }
  0x53   : > { %p1743_p1 = por %p1742_p10, %p1741_p12 }
  0x54   : > { %p1737_p2 = pneg %p1736_p8 }
  0x56   : > { %p1744_p7 = pnand %p1743_p1, %p1737_p2 }
  0x58   : > { %1747 = shalt.err (!%p1744_p7)
}
  0x59   : > { %s2379_s28 = smov 4   ;;  %s2380_s5 = smov 64  }
  0x5a   : > { %s2381_s4 = sld [smem:[#allocation29_spill]]  ;;  %s1759_s19 = scalar_lea.vmem %s289_s9, 256 }
  0x5b   : > { %p1760_p4 = scmp.ne.s32.totalorder %s289_s9, %s1759_s19  ;;  %p2382_p8 = pmov %p2378_p5 }
  0x5c   : > { %p1767_p12 = scmp.lt.s32.totalorder %s289_s9, %s289_s9  ;;  %p1768_p2 = scmp.lt.s32.totalorder %s1759_s19, %s1759_s19 }
  0x5d   : > { %p1762_p13 = pnand %p1760_p4, %p2382_p8 }
  0x5e   : > { %p1769_p5 = por %p1768_p2, %p1767_p12 }
  0x5f   : > { %p1763_p9 = pneg %p1762_p13 }
  0x60   : > { %1523 = dma.hbm_to_vmem [thread:$0]  (!%p2027_p6), %s2381_s4, 256, %s263_s15, [#allocation11], %s2380_s5, %s2380_s5, %s2379_s28  }
  0x61   : > { %p1770_p10 = pnand %p1769_p5, %p1763_p9 }
  0x63   : > { %1773 = shalt.err (!%p1770_p10)
}
  0x64   : > { %1529 = dma.hbm_to_vmem [thread:$0]  (!%p2027_p6), %s2343_s6, 256, %s289_s9, [#allocation14], %s2380_s5, %s2380_s5, %s2379_s28  }
  0x65   : > { %s312_s22 = scalar_lea.hbm %s2337_s0, %s2092_s20  ;;  %s306_s16 = scalar_lea.vmem [#allocation4], %s2096_s21 }
  0x66   : > { %s314_s17 = sshll.u32 %s306_s16, 4  ;;  %s348_s4 = scalar_lea.hbm %s2339_s2, %s2092_s20  ;;  %s315_s17 = int_to_ptr.vmem [resolvable:$true] %s314_s17 }
  0x67   : > { %s2383_s29 = sand.u32 1, %s1910_s26   ;;  %s1787_s1 = scalar_lea.vmem %s315_s17, 64 }
  0x68   : > { %s303_s18 = scalar_lea.sflag [#allocation5], %s2383_s29  ;;  %p1788_p1 = scmp.ne.s32.totalorder %s315_s17, %s1787_s1 }
  0x69   : > { %p2384_p7 = pneg %p2100_p0  ;;  %s1931_s9 = smov [#allocation4]  }
  0x6a   : > { %s1792_s28 = sshll.u32 %s1931_s9, 4  ;;  %s1793_s28 = int_to_ptr.vmem [resolvable:$false] %s1792_s28 }
  0x6b   : > { %p1790_p4 = pnand %p1788_p1, %p2384_p7  ;;  %s1794_s5 = scalar_lea.vmem %s1793_s28, 128 }
  0x6c   : > { %p1795_p6 = scmp.lt.s32.totalorder %s315_s17, %s1793_s28  ;;  %p1796_p13 = scmp.lt.s32.totalorder %s1794_s5, %s1787_s1 }
  0x6d   : > { %p1791_p8 = pneg %p1790_p4 }
  0x6e   : > { %p1797_p9 = por %p1796_p13, %p1795_p6 }
  0x70   : > { %p1798_p12 = pnand %p1797_p9, %p1791_p8 }
  0x72   : > { %1801 = shalt.err (!%p1798_p12)
}
  0x73   : > { %1533 = dma.hbm_to_vmem [thread:$0]  (!%p2100_p0), %s312_s22, 64, %s315_s17, %s303_s18  }
  0x74   : > { %s343_s29 = scalar_lea.vmem [#allocation9], %s2096_s21  ;;  %p2385_p5 = pmov %p2384_p7 }
  0x75   : > { %s350_s10 = sshll.u32 %s343_s29, 4  ;;  %s1932_s15 = smov [#allocation9]   ;;  %s351_s10 = int_to_ptr.vmem [resolvable:$true] %s350_s10 }
  0x76   : > { %s1815_s3 = scalar_lea.vmem %s351_s10, 64  ;;  %s1820_s16 = sshll.u32 %s1932_s15, 4  ;;  %s1821_s16 = int_to_ptr.vmem [resolvable:$false] %s1820_s16 }
  0x77   : > { %p1816_p2 = scmp.ne.s32.totalorder %s351_s10, %s1815_s3  ;;  %s1822_s11 = scalar_lea.vmem %s1821_s16, 128 }
  0x78   : > { %p1823_p7 = scmp.lt.s32.totalorder %s351_s10, %s1821_s16  ;;  %p1824_p4 = scmp.lt.s32.totalorder %s1822_s11, %s1815_s3 }
  0x79   : > { %p1818_p10 = pnand %p1816_p2, %p2385_p5 }
  0x7a   : > { %p1825_p8 = por %p1824_p4, %p1823_p7 }
  0x7b   : > { %p1819_p1 = pneg %p1818_p10 }
  0x7d   : > { %p1826_p6 = pnand %p1825_p8, %p1819_p1 }
  0x7f   : > { %1829 = shalt.err (!%p1826_p6)
}
  0x80   : > { %1539 = dma.hbm_to_vmem [thread:$0]  (!%p2100_p0), %s348_s4, 64, %s351_s10, %s2110_s23  }
  0x81   : > { %359 = sbr.rel (%p2018_p3) target bundleno = 1526 (0x5f6), region = 48  ;;  %s2173_s22 = sand.u32 (!%p2018_p3), 1, %s1906_s25  }
  0x82   : > { %s2176_s17 = sshll.u32 (!%p2018_p3), %s2173_s22, 2  ;;  %s362_s12 = scalar_lea.sflag (!%p2018_p3), [#allocation5], %s2173_s22 }
  0x83   : > { %s365_s19 = scalar_lea.vmem (!%p2018_p3), [#allocation4], %s2176_s17 }
  0x86   : > { %1881 = dma.done.wait (%p2074_p11), %s362_s12, 64  }
  0x87   : > { %1883 = vsyncadd (%p2074_p11), %s362_s12, 4294967232  ;;  %s370_s4 = sand.u32 1, %s2013_s30   ;;  %s374_s23 = scalar_lea.vmem [#allocation7], %s2176_s17 }
  0x88   : > { %s371_s8 = scalar_lea.sflag [#allocation8], %s370_s4 }
  0x89   : > { %1885 = dma.done.wait (%p2074_p11), %s371_s8, 128  }
  0x8a   : > { %1887 = vsyncadd (%p2074_p11), %s371_s8, 4294967168  ;;  %s383_s20 = scalar_lea.vmem [#allocation9], %s2176_s17  ;;  %p2386_p3 = scmp.eq.s32.totalorder %s2013_s30, 0 }
  0x8c   : > { %1889 = dma.done.wait (%p2386_p3), [#allocation11], 512   ;;  %p2387_p0 = pmov %p2386_p3 }
  0x8e   : > { %1891 = vsyncadd (%p2387_p0), [#allocation11], 4294966784  ;;  %p2388_p13 = pmov %p2387_p0 }
  0x8f   : > { %p2389_p9 = pmov %p2387_p0 }
  0x90   : > { %1893 = dma.done.wait (%p2388_p13), [#allocation14], 512  }
  0x91   : > { %1895 = vsyncadd (%p2389_p9), [#allocation14], 4294966784  ;;  %v1933_v0 = vmov 0.0   ;;  %vm1934_vm0 = vmmov 0   ;;  %v1616_v1 = vld [vmem:[#allocation12 + $0x8] sm:$0xff]   ;;  %v1617_v2 = vld [vmem:[#allocation12] sm:$0xff]  }
  0x92   : > { %1413 = vmatprep.subr.bf16.mxu0 %v1933_v0  ;;  %1417 = vmatprep.mubr.msk.bf16.mxu0 %vm1934_vm0, %v1933_v0  ;;  %v445_v3 = vld [vmem:[%s374_s23] sm:$0xf]  ;;  %vm462_vm1 = vcmask 261120   ;;  %v1618_v4 = vld [vmem:[#allocation10 + $0x8] sm:$0xff]   ;;  %v1619_v5 = vld [vmem:[#allocation10] sm:$0xff]   ;;  %vm567_vm2 = vcmask 257024  }
  0x93   : > { %1421 = vmatprep.subr.bf16.mxu1 %v1933_v0  ;;  %1425 = vmatprep.mubr.msk.bf16.mxu1 %vm1934_vm0, %v1933_v0  ;;  %v571_v6 = vld [vmem:[%s365_s19] sm:$0xf]  ;;  %v1621_v8 = vld [vmem:[#allocation13] sm:$0xff]   ;;  %v506_v9 = vld [vmem:[%s383_s20] sm:$0xf]  ;;  %vm636_vm3 = vcmask 64512  }
  0x94   : > { %1414 = vmatpush3.bf16.msra.mxu0 %v1616_v1  ;;  %v1620_v7 = vld [vmem:[#allocation13 + $0x8] sm:$0xff]   ;;  %s1935_s30 = smov 112   ;;  %s1936_s13 = smov 120   ;;  %vm698_vm4 = vcmask 1043456   ;;  %vm1095_vm5 = vcmask 130048   ;;  %vm1098_vm6 = vcmask 195584  }
  0x95   : > { %1415 = vmatprep.subr.bf16.mxu0 %v1933_v0  ;;  %1422 = vmatpush3.bf16.msra.mxu1 %v1620_v7  ;;  %s1937_s1 = smov 104   ;;  %s1938_s9 = smov 8  }
  0x96   : > { %1423 = vmatprep.subr.bf16.mxu1 %v1933_v0  ;;  %s1939_s28 = smov 16   ;;  %s1940_s5 = smov 24  }
  0x97   : > { %s1358_s29 = sshll.u32 %s2173_s22, 3  ;;  %s1382_s10 = sshll.u32 %s1914_s27, 7 }
  0x98   : > { %1416 = vmatpush3.bf16.msra.mxu0 %v1617_v2  ;;  %s439_s3 = scalar_lea.vmem [#allocation16], %s1358_s29  ;;  %s2288_s18 = scalar_lea.hbm %s2344_s7, %s1382_s10 }
  0x99   : > { %1429 = vmatprep.subr.bf16.mxu0 %v1933_v0  ;;  %1424 = vmatpush3.bf16.msra.mxu1 %v1621_v8  ;;  %s1175_s15 = sshll.u32 %s439_s3, 4  ;;  %s1161_s21 = scalar_lea.sflag [#allocation6], %s2173_s22  ;;  %s2290_s15 = int_to_ptr.vmem [resolvable:$true] %s1175_s15 }
  0x9a   : > { %1437 = vmatprep.subr.bf16.mxu1 %v1933_v0  ;;  %s1830_s17 = scalar_lea.vmem %s2290_s15, 128  ;;  %p2390_p12 = scmp.ne.s32.totalorder %s2372_s14, 0 }
  0x9b   : > { %1418 = vmatmul.mubr.msk.bf16.vlgmr.msra.gmra.mxu0 %vm462_vm1, %v445_v3  ;;  %p1831_p11 = scmp.ne.s32.totalorder %s2290_s15, %s1830_s17  ;;  %s1941_s27 = smov [#allocation16]  }
  0x9c   : > { %1430 = vmatpush3.bf16.msra.mxu0 %v1618_v4  ;;  %1433 = vmatprep.mubr.msk.bf16.mxu0 %vm1934_vm0, %v1933_v0  ;;  %s1834_s12 = sshll.u32 %s1941_s27, 4  ;;  %s1835_s12 = int_to_ptr.vmem [resolvable:$false] %s1834_s12 }
  0x9d   : > { %1431 = vmatprep.subr.bf16.mxu0 %v1933_v0  ;;  %1426 = vmatmul.mubr.msk.bf16.vlgmr.msra.gmra.mxu1 %vm462_vm1, %v506_v9  ;;  %p1832_p2 = pnand %p1831_p11, %p2390_p12  ;;  %s1836_s19 = scalar_lea.vmem %s1835_s12, 256 }
  0x9e   : > { %1439 = vmatprep.mubr.msk.bf16.mxu1 %vm1934_vm0, %v1933_v0  ;;  %p1837_p10 = scmp.lt.s32.totalorder %s2290_s15, %s1835_s12  ;;  %p1838_p1 = scmp.lt.s32.totalorder %s1836_s19, %s1830_s17 }
  0x9f   : > { %p1833_p5 = pneg %p1832_p2 }
  0xa0   : > { %1432 = vmatpush3.bf16.msra.mxu0 %v1619_v5  ;;  %p1839_p7 = por %p1838_p1, %p1837_p10 }
  0xa1   : > { %1443 = vmatprep.subr.bf16.mxu0 %v1933_v0 }
  0xa2   : > { %p1840_p4 = pnand %p1839_p7, %p1833_p5 }
  0xa3   : > { %1434 = vmatmul.mubr.msk.bf16.vlgmr.msra.gmra.mxu0 %vm462_vm1, %v571_v6 }
  0xa4   : > { %1445 = vmatprep.mubr.msk.bf16.mxu0 %vm1934_vm0, %v1933_v0 }
 0x15b   : > { %v500_v10 = vpop.f32.mrf.mxu0 }
 0x15c   : > { %v566_v11 = vpack.c.bf16 %v500_v10, %v500_v10 }
 0x15d   : > { %v1419_v12 = vpop.f32.mrf.mxu0  ;;  %v560_v24 = vpop.f32.mrf.mxu1 }
 0x15e   : > { %568 = vst.msk [vmem:[#allocation2] sm:$0xf] %vm567_vm2, %v566_v11  ;;  %v569_v25 = vpack.c.bf16 %v560_v24, %v560_v24 }
 0x15f   : > { %v503_v13 = vpop.f32.mrf.mxu0  ;;  %v1427_v26 = vpop.f32.mrf.mxu1 }
 0x160   : > { %570 = vst.msk [vmem:[#allocation3] sm:$0xf] %vm567_vm2, %v569_v25 }
 0x161   : > { %v1420_v14 = vpop.f32.mrf.mxu0  ;;  %v563_v27 = vpop.f32.mrf.mxu1 }
 0x163   : > { %v626_v15 = vpop.f32.mrf.mxu0  ;;  %v1428_v28 = vpop.f32.mrf.mxu1 }
 0x164   : > { %v632_v16 = vmul.f32 0.35355338, %v626_v15 }
 0x165   : > { %v1435_v17 = vpop.f32.mrf.mxu0  ;;  %v634_v18 = vld [vmem:[#allocation2] sm:$0xf] }
 0x166   : > { %v641_v19 = vsel %vm636_vm3, %v634_v18, 0  ;;  %v1370_v20 = vcombine.low %v634_v18, %v634_v18  ;;  %v633_v22 = vpack.c.bf16 %v632_v16, %v632_v16 }
 0x167   : > { %1438 = vmatpush3.bf16.xpose.msra.mxu1 %v641_v19  ;;  %v629_v21 = vpop.f32.mrf.mxu0  ;;  %v635_v29 = vld [vmem:[#allocation3] sm:$0xf] }
 0x168   : > { %863 = vrot.lane.b32.xlu1 %v1370_v20, %s1935_s30  ;;  %749 = vrot.lane.b32.xlu0 %v1370_v20, %s1936_s13  ;;  %v700_v30 = vsel %vm698_vm4, %v635_v29, 0  ;;  %v1372_v2 = vcombine.low %v635_v29, %v635_v29 }
 0x169   : > { %v1436_v23 = vpop.f32.mrf.mxu0  ;;  %1449 = vmatprep.subr.bf16.mxu1 %v1933_v0  ;;  %1444 = vmatpush3.bf16.msra.mxu0 %v700_v30 }
 0x16a   : > { %1455 = vmatprep.subr.bf16.mxu0 %v1933_v0 }
 0x16c   : > { %861 = vrot.lane.b32.xlu1 %v633_v22, %s1935_s30  ;;  %744 = vrot.lane.b32.xlu0 %v633_v22, %s1936_s13 }
 0x16e   : > { %1440 = vmatmul.mubr.msk.bf16.vlgmr.msra.gmra.mxu1 %vm636_vm3, %v633_v22 }
 0x16f   : > { %1451 = vmatprep.mubr.msk.bf16.mxu1 %vm1934_vm0, %v1933_v0 }
 0x170   : > { %972 = vrot.lane.b32.xlu1 %v633_v22, %s1937_s1  ;;  %974 = vrot.lane.b32.xlu0 %v1370_v20, %s1937_s1 }
 0x1da   : > { %v750_v31 = vpop.permute.xlu0 %749  ;;  %v864_v33 = vpop.permute.xlu1 %863 }
 0x1db   : > { %v755_v32 = vsel %vm636_vm3, %v750_v31, 0  ;;  %v869_v35 = vsel %vm636_vm3, %v864_v33, 0 }
 0x1dc   : > { %1450 = vmatpush3.bf16.xpose.msra.mxu1 %v755_v32 }
 0x1dd   : > { %1461 = vmatprep.subr.bf16.mxu1 %v1933_v0 }
 0x1de   : > { %v745_v34 = vpop.permute.xlu0 %744  ;;  %v862_v37 = vpop.permute.xlu1 %861 }
 0x1e2   : > { %v975_v36 = vpop.permute.xlu0 %974  ;;  %v973_v39 = vpop.permute.xlu1 %972 }
 0x1e3   : > { %1452 = vmatmul.mubr.msk.bf16.vlgmr.msra.gmra.mxu1 %vm636_vm3, %v745_v34  ;;  %v980_v38 = vsel %vm636_vm3, %v975_v36, 0 }
 0x1e4   : > { %1462 = vmatpush3.bf16.xpose.msra.mxu1 %v869_v35  ;;  %1463 = vmatprep.mubr.msk.bf16.mxu1 %vm1934_vm0, %v1933_v0 }
 0x1e5   : > { %1473 = vmatprep.subr.bf16.mxu1 %v1933_v0 }
 0x1eb   : > { %1464 = vmatmul.mubr.msk.bf16.vlgmr.msra.gmra.mxu1 %vm636_vm3, %v862_v37 }
 0x1ec   : > { %1474 = vmatpush3.bf16.xpose.msra.mxu1 %v980_v38  ;;  %1475 = vmatprep.mubr.msk.bf16.mxu1 %vm1934_vm0, %v1933_v0 }
 0x1ed   : > { %1485 = vmatprep.subr.bf16.mxu1 %v1933_v0 }
 0x1f3   : > { %1476 = vmatmul.mubr.msk.bf16.vlgmr.msra.gmra.mxu1 %vm636_vm3, %v973_v39 }
 0x1f4   : > { %1489 = vmatprep.mubr.msk.bf16.mxu1 %vm1934_vm0, %v1933_v0 }
 0x22e   : > { %v677_v40 = vpop.f32.mrf.mxu1 }
 0x22f   : > { %v683_v41 = vsel %vm636_vm3, %v677_v40, -inf }
 0x230   : > { %684 = vmax.xlane.f32.xlu0 %v683_v41  ;;  %v1441_v42 = vpop.f32.mrf.mxu1 }
 0x232   : > { %v680_v43 = vpop.f32.mrf.mxu1 }
 0x234   : > { %v1442_v44 = vpop.f32.mrf.mxu1 }
 0x235   : > { %v1624_v44 = vld [vmem:[#allocation15 + $0x8] sm:$0xff]  }
 0x236   : > { %1486 = vmatpush3.bf16.msra.mxu1 %v1624_v44 }
 0x237   : > { %1487 = vmatprep.subr.bf16.mxu1 %v1933_v0 }
 0x2a3   : > { %v791_v45 = vpop.f32.mrf.mxu1 }
 0x2a4   : > { %v797_v46 = vsel %vm636_vm3, %v791_v45, -inf }
 0x2a5   : > { %798 = vmax.xlane.f32.xlu1 %v797_v46  ;;  %v1453_v47 = vpop.f32.mrf.mxu1  ;;  %v1625_v46 = vld [vmem:[#allocation15] sm:$0xff]  }
 0x2a6   : > { %1488 = vmatpush3.bf16.msra.mxu1 %v1625_v46 }
 0x2a7   : > { %v794_v48 = vpop.f32.mrf.mxu1 }
 0x2a9   : > { %v1454_v49 = vpop.f32.mrf.mxu1 }
 0x2ab   : > { %v905_v50 = vpop.f32.mrf.mxu1 }
 0x2ac   : > { %v911_v51 = vsel %vm636_vm3, %v905_v50, -inf }
 0x2ad   : > { %912 = vmax.xlane.f32.xlu0 %v911_v51  ;;  %v1465_v52 = vpop.f32.mrf.mxu1 }
 0x2af   : > { %v908_v53 = vpop.f32.mrf.mxu1 }
 0x2b1   : > { %v1466_v54 = vpop.f32.mrf.mxu1 }
 0x2b3   : > { %v1016_v55 = vpop.f32.mrf.mxu1 }
 0x2b4   : > { %v1022_v56 = vsel %vm636_vm3, %v1016_v55, -inf }
 0x2b5   : > { %1023 = vmax.xlane.f32.xlu0 %v1022_v56  ;;  %v1477_v57 = vpop.f32.mrf.mxu1 }
 0x2b7   : > { %v1019_v58 = vpop.f32.mrf.mxu1 }
 0x2b9   : > { %v685_v59 = vpop.xlane.xlu0 %684  ;;  %v1478_v60 = vpop.f32.mrf.mxu1 }
 0x2ba   : > { %v686_v61 = vsub.f32 %v677_v40, %v685_v59 }
 0x2bc   : > { %v687_v62 = vmul.f32 1.442695, %v686_v61 }
 0x2be   : > { %1626 = vpow2.f32 %v687_v62 }
 0x2cb   : > { %v1627_v63 = vpop.eup %1626 }
 0x2cc   : > { %v689_v1 = vsel %vm636_vm3, %v1627_v63, 0.0 }
 0x2cd   : > { %690 = vadd.xlane.f32.xlu1 %v689_v1 }
 0x2de   : > { %812 = vrot.lane.b32.xlu1 %v1372_v2, %s1936_s13 }
 0x32e   : > { %v799_v3 = vpop.xlane.xlu1 %798 }
 0x32f   : > { %v800_v4 = vsub.f32 %v791_v45, %v799_v3 }
 0x331   : > { %v801_v5 = vmul.f32 1.442695, %v800_v4 }
 0x333   : > { %1628 = vpow2.f32 %v801_v5 }
 0x336   : > { %v913_v6 = vpop.xlane.xlu0 %912 }
 0x337   : > { %v914_v7 = vsub.f32 %v905_v50, %v913_v6 }
 0x339   : > { %v915_v8 = vmul.f32 1.442695, %v914_v7 }
 0x33b   : > { %1630 = vpow2.f32 %v915_v8 }
 0x33e   : > { %v1024_v9 = vpop.xlane.xlu0 %1023 }
 0x33f   : > { %v1025_v10 = vsub.f32 %v1016_v55, %v1024_v9 }
 0x340   : > { %v1629_v11 = vpop.eup %1628 }
 0x341   : > { %v1026_v12 = vmul.f32 1.442695, %v1025_v10  ;;  %v803_v13 = vsel %vm636_vm3, %v1629_v11, 0.0 }
 0x342   : > { %804 = vadd.xlane.f32.xlu0 %v803_v13 }
 0x343   : > { %1632 = vpow2.f32 %v1026_v12 }
 0x348   : > { %v1631_v14 = vpop.eup %1630 }
 0x349   : > { %v917_v15 = vsel %vm636_vm3, %v1631_v14, 0.0 }
 0x34a   : > { %918 = vadd.xlane.f32.xlu1 %v917_v15 }
 0x350   : > { %v1633_v16 = vpop.eup %1632 }
 0x351   : > { %v1028_v17 = vsel %vm636_vm3, %v1633_v16, 0.0 }
 0x352   : > { %1029 = vadd.xlane.f32.xlu0 %v1028_v17 }
 0x356   : > { %v691_v18 = vpop.xlane.xlu1 %690 }
 0x357   : > { %1634 = vrcp.f32 %v691_v18 }
 0x35a   : > { %v813_v21 = vpop.permute.xlu1 %812 }
 0x35b   : > { %1034 = vrot.lane.b32.xlu1 %v1372_v2, %s1937_s1  ;;  %v818_v23 = vsel %vm698_vm4, %v813_v21, 0 }
 0x364   : > { %v1635_v19 = vpop.eup %1634 }
 0x365   : > { %v693_v20 = vmul.f32 %v1635_v19, %v1627_v63 }
 0x367   : > { %v694_v22 = vpack.c.bf16 %v693_v20, %v693_v20 }
 0x368   : > { %923 = vrot.lane.b32.xlu0 %v1372_v2, %s1935_s30 }
 0x369   : > { %1446 = vmatmul.mubr.msk.bf16.vlgmr.msra.gmra.mxu0 %vm636_vm3, %v694_v22 }
 0x36a   : > { %1456 = vmatpush3.bf16.msra.mxu0 %v818_v23  ;;  %1457 = vmatprep.mubr.msk.bf16.mxu0 %vm1934_vm0, %v1933_v0 }
 0x36b   : > { %1467 = vmatprep.subr.bf16.mxu0 %v1933_v0 }
 0x3cb   : > { %v805_v24 = vpop.xlane.xlu0 %804 }
 0x3cc   : > { %1636 = vrcp.f32 %v805_v24 }
 0x3d3   : > { %v919_v25 = vpop.xlane.xlu1 %918 }
 0x3d4   : > { %1638 = vrcp.f32 %v919_v25 }
 0x3d7   : > { %v1035_v34 = vpop.permute.xlu1 %1034 }
 0x3d8   : > { %v1040_v36 = vsel %vm698_vm4, %v1035_v34, 0 }
 0x3d9   : > { %v1637_v26 = vpop.eup %1636 }
 0x3da   : > { %v807_v27 = vmul.f32 %v1637_v26, %v1629_v11 }
 0x3db   : > { %v1030_v28 = vpop.xlane.xlu0 %1029 }
 0x3dc   : > { %1640 = vrcp.f32 %v1030_v28  ;;  %v808_v29 = vpack.c.bf16 %v807_v27, %v807_v27 }
 0x3de   : > { %1458 = vmatmul.mubr.msk.bf16.vlgmr.msra.gmra.mxu0 %vm636_vm3, %v808_v29 }
 0x3df   : > { %v924_v30 = vpop.permute.xlu0 %923  ;;  %1469 = vmatprep.mubr.msk.bf16.mxu0 %vm1934_vm0, %v1933_v0 }
 0x3e0   : > { %v929_v31 = vsel %vm698_vm4, %v924_v30, 0 }
 0x3e1   : > { %v1639_v32 = vpop.eup %1638  ;;  %1468 = vmatpush3.bf16.msra.mxu0 %v929_v31 }
 0x3e2   : > { %1479 = vmatprep.subr.bf16.mxu0 %v1933_v0  ;;  %v921_v33 = vmul.f32 %v1639_v32, %v1631_v14 }
 0x3e4   : > { %v922_v35 = vpack.c.bf16 %v921_v33, %v921_v33 }
 0x3e6   : > { %1470 = vmatmul.mubr.msk.bf16.vlgmr.msra.gmra.mxu0 %vm636_vm3, %v922_v35 }
 0x3e7   : > { %1480 = vmatpush3.bf16.msra.mxu0 %v1040_v36  ;;  %1481 = vmatprep.mubr.msk.bf16.mxu0 %vm1934_vm0, %v1933_v0 }
 0x3e9   : > { %v1641_v37 = vpop.eup %1640 }
 0x3ea   : > { %v1032_v38 = vmul.f32 %v1641_v37, %v1633_v16 }
 0x3ec   : > { %v1033_v39 = vpack.c.bf16 %v1032_v38, %v1032_v38 }
 0x3ee   : > { %1482 = vmatmul.mubr.msk.bf16.vlgmr.msra.gmra.mxu0 %vm636_vm3, %v1033_v39 }
 0x429   : > { %v736_v40 = vpop.f32.mrf.mxu0 }
 0x42a   : > { %v742_v61 = vpack.c.bf16 %v736_v40, %v736_v40 }
 0x42b   : > { %v1447_v41 = vpop.f32.mrf.mxu0 }
 0x42d   : > { %v739_v42 = vpop.f32.mrf.mxu0 }
 0x42f   : > { %v1448_v43 = vpop.f32.mrf.mxu0 }
 0x49e   : > { %v854_v45 = vpop.f32.mrf.mxu0 }
 0x49f   : > { %v860_v47 = vpack.c.bf16 %v854_v45, %v854_v45 }
 0x4a0   : > { %v1459_v48 = vpop.f32.mrf.mxu0 }
 0x4a1   : > { %1084 = vrot.lane.b32.xlu1 %v860_v47, %s1938_s9 }
 0x4a2   : > { %v857_v49 = vpop.f32.mrf.mxu0 }
 0x4a4   : > { %v1460_v50 = vpop.f32.mrf.mxu0 }
 0x4a6   : > { %v965_v51 = vpop.f32.mrf.mxu0 }
 0x4a7   : > { %v971_v52 = vpack.c.bf16 %v965_v51, %v965_v51 }
 0x4a8   : > { %v1471_v53 = vpop.f32.mrf.mxu0 }
 0x4a9   : > { %1087 = vrot.lane.b32.xlu0 %v971_v52, %s1939_s28 }
 0x4aa   : > { %v968_v54 = vpop.f32.mrf.mxu0 }
 0x4ac   : > { %v1472_v55 = vpop.f32.mrf.mxu0 }
 0x4ae   : > { %v1076_v56 = vpop.f32.mrf.mxu0 }
 0x4af   : > { %v1082_v57 = vpack.c.bf16 %v1076_v56, %v1076_v56 }
 0x4b0   : > { %v1483_v58 = vpop.f32.mrf.mxu0 }
 0x4b1   : > { %1090 = vrot.lane.b32.xlu1 %v1082_v57, %s1940_s5 }
 0x4b2   : > { %v1079_v0 = vpop.f32.mrf.mxu0 }
 0x4b4   : > { %v1484_v59 = vpop.f32.mrf.mxu0 }
 0x513   : > { %v1085_v60 = vpop.permute.xlu1 %1084 }
 0x514   : > { %v1094_v63 = vsel %vm636_vm3, %v742_v61, %v1085_v60 }
 0x51b   : > { %v1088_v62 = vpop.permute.xlu0 %1087 }
 0x51c   : > { %v1097_v1 = vsel %vm1095_vm5, %v1094_v63, %v1088_v62 }
 0x523   : > { %v1091_v2 = vpop.permute.xlu1 %1090 }
 0x524   : > { %v1100_v3 = vsel %vm1098_vm6, %v1097_v1, %v1091_v2 }
 0x525   : > { %1490 = vmatmul.mubr.msk.bf16.vlgmr.msra.gmra.mxu1 %vm462_vm1, %v1100_v3 }
 0x5e5   : > { %v1153_v4 = vpop.f32.mrf.mxu1 }
 0x5e6   : > { %1159 = vst.msk [vmem:[%s439_s3] sm:$0xff] %vm462_vm1, %v1153_v4 }
 0x5e7   : > { %v1491_v5 = vpop.f32.mrf.mxu1 }
 0x5e8   : > { %1843 = shalt.err (!%p1840_p4)
}
 0x5e9   : > { %s1844_s4 = scalar_lea.hbm %s2288_s18, 128  ;;  %s1848_s23 = scalar_lea.hbm %s2344_s7, 256 }
 0x5ea   : > { %p1845_p8 = scmp.ne.s32.totalorder %s2288_s18, %s1844_s4  ;;  %p1849_p0 = scmp.lt.s32.totalorder %s2288_s18, %s2344_s7 }
 0x5eb   : > { %p1850_p13 = scmp.lt.s32.totalorder %s1848_s23, %s1844_s4 }
 0x5ec   : > { %p1846_p6 = pnand %p1845_p8, %p2390_p12 }
 0x5ed   : > { %p1851_p9 = por %p1850_p13, %p1849_p0 }
 0x5ee   : > { %p1847_p3 = pneg %p1846_p6 }
 0x5f0   : > { %p1852_p11 = pnand %p1851_p9, %p1847_p3 }
 0x5f2   : > { %1855 = shalt.err (!%p1852_p11)
}
 0x5f3   : > { %1515 = dma.vmem_to_hbm [thread:$0]  (%p2390_p12), %s2290_s15, 128, %s2288_s18, %s1161_s21   ;;  %v1156_v6 = vpop.f32.mrf.mxu1 }
 0x5f5   : > { %v1492_v7 = vpop.f32.mrf.mxu1 }
 0x5f6 PF: > { %s2391_s13 = sld [smem:[#allocation26_spill]]  ;;  %s1187_s9 = sand.u32 1, %s1902_s24  }
 0x5f7   : > { %s2392_s1 = sld [smem:[#allocation23_spill]]  ;;  %s1188_s28 = scalar_lea.sflag [#allocation6], %s1187_s9 }
 0x5fc   : > { %p2393_p2 = scmp.ne.s32.totalorder %s2391_s13, 0 }
 0x5fd   : > { %p2394_p5 = scmp.ge.s32.totalorder %s2392_s1, 2 }
 0x5ff   : > { %p1541_p10 = pnand %p2394_p5, %p2393_p2 }
 0x601   : > { %p1542_p1 = pneg %p1541_p10 }
 0x603   : > { %1897 = dma.done.wait (%p1542_p1), %s1188_s28, 128  }
 0x604   : > { %1899 = vsyncadd (%p1542_p1), %s1188_s28, 4294967168  ;;  %s28_s29 = sadd.s32 1, %s2392_s1   ;;  %s2395_s14 = sld [smem:[#allocation25_spill]] }
 0x605   : > { %p25_p7 = scmp.ge.s32.totalorder %s28_s29, 4   ;;  %s2396_s27 = sld [smem:[#allocation22_spill]] }
 0x606   : > { %s2397_s28 = sld [smem:[#allocation24_spill]]  ;;  %s2398_s24 = smov %s1906_s25 }
 0x607   : > { %s2399_s25 = smov %s1910_s26  ;;  %27 = sbr.rel (!%p25_p7) target bundleno = 15 (0xf), region = 137 }
 0x60a   : > { %s2400_s26 = smov %s2395_s14 }
 0x60c   :  { %1193 = vsyncpa [#allocation5], 1 }
 0x60d   :  { %1195 = vsyncpa [#allocation5 + $0x1], 1 }
 0x60e   :  { %1196 = vsyncpa [#allocation8], 1 }
 0x60f   :  { %1198 = vsyncpa [#allocation8 + $0x1], 1 }
 0x610   :  { %1199 = vsyncpa [#allocation11], 1 }
 0x611   :  { %1200 = vsyncpa [#allocation14], 1 }
 0x612   :  { %1201 = vsyncpa [#allocation6], 1 }
 0x613   :  { %1203 = vsyncpa [#allocation6 + $0x1], 1 }

</bundles_post_ra>
